<compile_context>
chip_gen: v7x
topology: tpu7x:2x2x1
jax: 0.10.0
libtpu: 0.0.40
codegen_flags: <defaults>
</compile_context>

<pallas_src>
import jax
import jax.numpy as jnp
from jax.experimental import pallas as pl
from jax.experimental.pallas import tpu as pltpu


def _decoder_kernel(
    # ---- inputs ----
    h_ref,                # (B, T, 2H)   encoder hidden states (resident)
    hemb_ref,             # (1, B, H)    nn_h(h) for timestep i (pipelined per step)
    s0_ref,               # (B, H)       initial decoder state tanh(Ws(h[:,0,H:]))
    wsg_ref, bsg_ref,     # (H, 4H), (1, 4H)        [nn_s | GRU W_hh]
    nnv_w_ref, nnv_b_ref, # (H, T), (1, T)          alignment nn_v
    wih_ref, bih_ref,     # (E+2H, 3H), (1, 3H)     GRU W_ih
    wsn_ref, bsn_ref,     # (H, E+2M), (1, E+2M)    [embedding | u_o even | u_o odd]
    wyc_ref, byc_ref,     # (E+2H, 2M), (1, 2M)     [v_o ; c_o] (even|odd columns)
    wout_ref, bout_ref,   # (M, V), (1, V)          output_nn
    # ---- outputs (VMEM-resident across the grid, one writeback at the end) ----
    out_ref,              # (T, B, V)
    align_ref,            # (T, B, T)
    # ---- scratch (persists across grid steps) ----
    s_scr,                # (B, H)   decoder hidden state
    y_scr,                # (B, E)   previous embedded output
):
    i = pl.program_id(0)
    f32 = jnp.float32
    H = s0_ref.shape[1]
    E = y_scr.shape[1]
    M = wout_ref.shape[0]

    @pl.when(i == 0)
    def _init():
        s_scr[...] = s0_ref[...]
        y_scr[...] = jnp.zeros_like(y_scr)

    s = s_scr[...]                                   # (B, H)
    y = y_scr[...]                                   # (B, E)
    he = hemb_ref[0]                                 # (B, H)

    # fused: [nn_s(s) | W_hh @ s] in one MXU launch
    sg = jnp.dot(s, wsg_ref[...], preferred_element_type=f32) + bsg_ref[...]
    s_emb = sg[:, :H]                                # (B, H)
    gh = sg[:, H:]                                   # (B, 3H)

    # alignment: a = nn_v(tanh(nn_s(s) + nn_h(h)_i))
    a = (jnp.dot(jnp.tanh(s_emb + he), nnv_w_ref[...], preferred_element_type=f32)
         + nnv_b_ref[...])                           # (B, T)
    align_ref[i] = a

    # softmax over the sequence axis (EUP reciprocal for the normalization)
    a_max = jnp.max(a, axis=1, keepdims=True)
    ea = jnp.exp(a - a_max)
    e = ea * pl.reciprocal(jnp.sum(ea, axis=1, keepdims=True), approx=True)

    # context: c[b, :] = e[b, :] @ h[b, :, :]   (batched MXU matmul)
    c = jnp.einsum("bqt,btd->bqd", e[:, None, :], h_ref[...],
                   preferred_element_type=f32)[:, 0, :]            # (B, 2H)

    # GRU step (PyTorch gate semantics)
    x = jnp.concatenate([y, c], axis=1)              # (B, E + 2H)
    gi = jnp.dot(x, wih_ref[...], preferred_element_type=f32) + bih_ref[...]
    r = jax.nn.sigmoid(gi[:, :H] + gh[:, :H])
    z = jax.nn.sigmoid(gi[:, H:2 * H] + gh[:, H:2 * H])
    n = jnp.tanh(gi[:, 2 * H:] + r * gh[:, 2 * H:])
    s_new = (1.0 - z) * n + z * s                    # (B, H)

    # fused: [embedding(s_new) | u_o(s_new) (even|odd)] in one MXU launch
    sn = jnp.dot(s_new, wsn_ref[...], preferred_element_type=f32) + bsn_ref[...]
    y_new = sn[:, :E]                                # (B, E)
    u = sn[:, E:]                                    # (B, 2M) (includes u_o bias)

    # fused: v_o(y_new) + c_o(c) in one MXU launch
    yc = jnp.concatenate([y_new, c], axis=1)         # (B, E + 2H)
    vc = jnp.dot(yc, wyc_ref[...], preferred_element_type=f32) + byc_ref[...]

    # maxout (columns pre-permuted in the wrapper: [:M] == even units, [M:] == odd units)
    tt = u + vc                                      # (B, 2M)
    t = jnp.maximum(tt[:, :M], tt[:, M:])            # (B, M)

    out_ref[i] = jnp.dot(t, wout_ref[...], preferred_element_type=f32) + bout_ref[...]

    # carry state to the next grid step
    s_scr[...] = s_new
    y_scr[...] = y_new


def _const_spec(arr):
    n = arr.ndim
    # TODO(synk): single-buffer these invariant inputs (pipeline_mode=pl.Buffered(1)) once
    # guaranteed available in the target JAX version; halves their VMEM footprint on v7x.
    return pl.BlockSpec(arr.shape, lambda i, _n=n: (0,) * _n)


def _evenodd_rows(w):
    # permute Linear weight rows so the first half are the even output units and the
    # second half the odd ones (matches t_tilde[:, 0::2] / t_tilde[:, 1::2]).
    return jnp.concatenate([w[0::2], w[1::2]], axis=0)


def _evenodd_cols(b):
    return jnp.concatenate([b[:, 0::2], b[:, 1::2]], axis=1)


def decoder_forward(h_btd, p):
    """h_btd: (B, T, 2H) encoder states. Returns (output (B,T,V), alignments (B,T,T))."""
    B, T, H2 = h_btd.shape
    H = H2 // 2
    E = p["emb_w"].shape[0]
    M = p["uo_w"].shape[0] // 2
    V = p["out_w"].shape[0]

    h = h_btd.astype(jnp.float32)

    # ---- hoisted precomputes (plain XLA matmuls, outside the sequential grid) ----
    s0 = jnp.tanh(h[:, 0, H:] @ p["ws_w"].T + p["ws_b"])               # (B, H)
    hemb_t = jnp.transpose(h @ p["nnh_w"].T + p["nnh_b"], (1, 0, 2))   # (T, B, H)

    # ---- pre-transposed / fused weights, (in, out) layout ----
    wsg = jnp.concatenate([p["nns_w"].T, p["w_hh"].T], axis=1)         # (H, 4H)
    bsg = jnp.concatenate([p["nns_b"], p["b_hh"]], axis=1)             # (1, 4H)
    nnv_wT = p["nnv_w"].T                                              # (H, T)
    wih = p["w_ih"].T                                                  # (E+2H, 3H)
    wsn = jnp.concatenate([p["emb_w"].T, _evenodd_rows(p["uo_w"]).T], axis=1)   # (H, E+2M)
    bsn = jnp.concatenate([p["emb_b"], _evenodd_cols(p["uo_b"])], axis=1)       # (1, E+2M)
    wyc = jnp.concatenate([_evenodd_rows(p["vo_w"]).T,
                           _evenodd_rows(p["co_w"]).T], axis=0)        # (E+2H, 2M)
    byc = _evenodd_cols(p["vo_b"]) + _evenodd_cols(p["co_b"])          # (1, 2M)
    wout = p["out_w"].T                                                # (M, V)
    bout = p["out_b"]                                                  # (1, V)

    weights = [wsg, bsg, nnv_wT, p["nnv_b"], wih, p["b_ih"],
               wsn, bsn, wyc, byc, wout, bout]

    in_specs = (
        [pl.BlockSpec((B, T, H2), lambda i: (0, 0, 0)),     # h (resident)
         pl.BlockSpec((1, B, H), lambda i: (i, 0, 0)),      # h_emb (per timestep)
         _const_spec(s0)]
        + [_const_spec(w) for w in weights]
    )

    out_shape = (
        jax.ShapeDtypeStruct((T, B, V), jnp.float32),
        jax.ShapeDtypeStruct((T, B, T), jnp.float32),
    )
    # constant index map -> outputs stay resident in VMEM; single HBM writeback at the end
    out_specs = (
        pl.BlockSpec((T, B, V), lambda i: (0, 0, 0)),
        pl.BlockSpec((T, B, T), lambda i: (0, 0, 0)),
    )

    out_tbv, align_tbt = pl.pallas_call(
        _decoder_kernel,
        grid=(T,),
        in_specs=in_specs,
        out_specs=out_specs,
        out_shape=out_shape,
        scratch_shapes=[
            pltpu.VMEM((B, H), jnp.float32),
            pltpu.VMEM((B, E), jnp.float32),
        ],
        compiler_params=pltpu.CompilerParams(
            dimension_semantics=("arbitrary",),        # time axis is a recurrence
            vmem_limit_bytes=64 * 1024 * 1024,
        ),
    )(h, hemb_t, s0, *weights)

    return jnp.transpose(out_tbv, (1, 0, 2)), jnp.transpose(align_tbt, (1, 0, 2))


def decoder_reference(h, p):
    """Pure-JAX reference reproducing the PyTorch forward (non-traditional path)."""
    B, T, H2 = h.shape
    H = H2 // 2
    s = jnp.tanh(h[:, 0, H:] @ p["ws_w"].T + p["ws_b"][0])
    y = jnp.zeros((B, p["emb_w"].shape[0]), jnp.float32)
    h_emb = h @ p["nnh_w"].T + p["nnh_b"][0]
    outs, aligns = [], []
    for i in range(T):
        s_emb = s @ p["nns_w"].T + p["nns_b"][0]
        a = jnp.tanh(s_emb + h_emb[:, i, :]) @ p["nnv_w"].T + p["nnv_b"][0]
        aligns.append(a)
        e = jax.nn.softmax(a, axis=1)
        c = jnp.einsum("btd,bt->bd", h, e)
        x = jnp.concatenate([y, c], axis=1)
        gi = x @ p["w_ih"].T + p["b_ih"][0]
        gh = s @ p["w_hh"].T + p["b_hh"][0]
        r = jax.nn.sigmoid(gi[:, :H] + gh[:, :H])
        z = jax.nn.sigmoid(gi[:, H:2 * H] + gh[:, H:2 * H])
        n = jnp.tanh(gi[:, 2 * H:] + r * gh[:, 2 * H:])
        s = (1.0 - z) * n + z * s
        y = s @ p["emb_w"].T + p["emb_b"][0]
        tt = (s @ p["uo_w"].T + p["uo_b"][0]
              + y @ p["vo_w"].T + p["vo_b"][0]
              + c @ p["co_w"].T + p["co_b"][0])
        t = jnp.maximum(tt[:, 0::2], tt[:, 1::2])
        outs.append(t @ p["out_w"].T + p["out_b"][0])
    return jnp.stack(outs, axis=1), jnp.stack(aligns, axis=1)


def init_params(key, H, E, T, M, V):
    keys = jax.random.split(key, 11)

    def lin(k, out_dim, in_dim, std):
        kw, kb = jax.random.split(k)
        w = std * jax.random.normal(kw, (out_dim, in_dim), jnp.float32)
        b = std * jax.random.normal(kb, (1, out_dim), jnp.float32)
        return w, b

    p = {}
    p["ws_w"], p["ws_b"] = lin(keys[0], H, H, 0.05)
    p["nnh_w"], p["nnh_b"] = lin(keys[1], H, 2 * H, 0.02)
    p["nns_w"], p["nns_b"] = lin(keys[2], H, H, 0.02)
    p["nnv_w"], p["nnv_b"] = lin(keys[3], T, H, 0.02)       # alignment output == seq len
    p["w_ih"], p["b_ih"] = lin(keys[4], 3 * H, E + 2 * H, 0.05)
    p["w_hh"], p["b_hh"] = lin(keys[5], 3 * H, H, 0.05)
    p["emb_w"], p["emb_b"] = lin(keys[6], E, H, 0.05)
    p["uo_w"], p["uo_b"] = lin(keys[7], 2 * M, H, 0.05)
    p["vo_w"], p["vo_b"] = lin(keys[8], 2 * M, E, 0.05)
    p["co_w"], p["co_b"] = lin(keys[9], 2 * M, 2 * H, 0.05)
    p["out_w"], p["out_b"] = lin(keys[10], V, M, 0.05)
    return p


if __name__ == "__main__":
    # small shapes consistent with the module: encoder is bidirectional (last dim 2H),
    # alignment output size == sequence length T, decoder GRU is single-layer.
    B, T, H, E, M, V = 2, 8, 32, 16, 16, 32
    key = jax.random.PRNGKey(0)
    kh, kp = jax.random.split(key)
    h = jax.random.normal(kh, (B, T, 2 * H), jnp.float32)
    params = init_params(kp, H, E, T, M, V)

    out, aligns = decoder_forward(h, params)
    jax.block_until_ready((out, aligns))

    ref_out, ref_al = decoder_reference(h, params)
    assert out.shape == (B, T, V) and aligns.shape == (B, T, T)
    assert jnp.allclose(out, ref_out, atol=2e-3, rtol=2e-3)
    assert jnp.allclose(aligns, ref_al, atol=2e-3, rtol=2e-3)
    print("KERNEL_OK")
</pallas_src>

<mosaic_0001>
module attributes {stable_mosaic.version = 11 : i64} {
  func.func @_decoder_kernel(%arg0: i32, %arg1: memref<2x8x64xf32, #tpu.memory_space<vmem>>, %arg2: memref<1x2x32xf32, #tpu.memory_space<vmem>>, %arg3: memref<2x32xf32, #tpu.memory_space<vmem>>, %arg4: memref<32x128xf32, #tpu.memory_space<vmem>>, %arg5: memref<1x128xf32, #tpu.memory_space<vmem>>, %arg6: memref<32x8xf32, #tpu.memory_space<vmem>>, %arg7: memref<1x8xf32, #tpu.memory_space<vmem>>, %arg8: memref<80x96xf32, #tpu.memory_space<vmem>>, %arg9: memref<1x96xf32, #tpu.memory_space<vmem>>, %arg10: memref<32x48xf32, #tpu.memory_space<vmem>>, %arg11: memref<1x48xf32, #tpu.memory_space<vmem>>, %arg12: memref<80x32xf32, #tpu.memory_space<vmem>>, %arg13: memref<1x32xf32, #tpu.memory_space<vmem>>, %arg14: memref<16x32xf32, #tpu.memory_space<vmem>>, %arg15: memref<1x32xf32, #tpu.memory_space<vmem>>, %arg16: memref<8x2x32xf32, #tpu.memory_space<vmem>>, %arg17: memref<8x2x8xf32, #tpu.memory_space<vmem>>, %arg18: memref<2x32xf32, #tpu.memory_space<vmem>>, %arg19: memref<2x16xf32, #tpu.memory_space<vmem>>) attributes {dimension_semantics = [#tpu.dimension_semantics<arbitrary>], iteration_bounds = array<i64: 8>, scalar_prefetch = 0 : i64, scratch_operands = 2 : i64, tpu.core_type = #tpu.core_type<tc>, window_params = [{pipeline_mode = #tpu.pipeline_mode<synchronous>, transform_indices = @transform_0, window_bounds = array<i64: 2, 8, 64>}, {transform_indices = @transform_1, window_bounds = array<i64: 1, 2, 32>}, {pipeline_mode = #tpu.pipeline_mode<synchronous>, transform_indices = @transform_2, window_bounds = array<i64: 2, 32>}, {pipeline_mode = #tpu.pipeline_mode<synchronous>, transform_indices = @transform_3, window_bounds = array<i64: 32, 128>}, {pipeline_mode = #tpu.pipeline_mode<synchronous>, transform_indices = @transform_4, window_bounds = array<i64: 1, 128>}, {pipeline_mode = #tpu.pipeline_mode<synchronous>, transform_indices = @transform_5, window_bounds = array<i64: 32, 8>}, {pipeline_mode = #tpu.pipeline_mode<synchronous>, transform_indices = @transform_6, window_bounds = array<i64: 1, 8>}, {pipeline_mode = #tpu.pipeline_mode<synchronous>, transform_indices = @transform_7, window_bounds = array<i64: 80, 96>}, {pipeline_mode = #tpu.pipeline_mode<synchronous>, transform_indices = @transform_8, window_bounds = array<i64: 1, 96>}, {pipeline_mode = #tpu.pipeline_mode<synchronous>, transform_indices = @transform_9, window_bounds = array<i64: 32, 48>}, {pipeline_mode = #tpu.pipeline_mode<synchronous>, transform_indices = @transform_10, window_bounds = array<i64: 1, 48>}, {pipeline_mode = #tpu.pipeline_mode<synchronous>, transform_indices = @transform_11, window_bounds = array<i64: 80, 32>}, {pipeline_mode = #tpu.pipeline_mode<synchronous>, transform_indices = @transform_12, window_bounds = array<i64: 1, 32>}, {pipeline_mode = #tpu.pipeline_mode<synchronous>, transform_indices = @transform_13, window_bounds = array<i64: 16, 32>}, {pipeline_mode = #tpu.pipeline_mode<synchronous>, transform_indices = @transform_14, window_bounds = array<i64: 1, 32>}, {pipeline_mode = #tpu.pipeline_mode<synchronous>, transform_indices = @transform_15, window_bounds = array<i64: 8, 2, 32>}, {pipeline_mode = #tpu.pipeline_mode<synchronous>, transform_indices = @transform_16, window_bounds = array<i64: 8, 2, 8>}]} {
    %c0_i32 = arith.constant 0 : i32
    %0 = arith.cmpi eq, %arg0, %c0_i32 : i32
    %1 = arith.extui %0 : i1 to i32
    %c0_i32_0 = arith.constant 0 : i32
    %2 = arith.cmpi ne, %1, %c0_i32_0 : i32
    scf.if %2 {
      %c0_53 = arith.constant 0 : index
      %c0_54 = arith.constant 0 : index
      %99 = vector.load %arg3[%c0_53, %c0_54] : memref<2x32xf32, #tpu.memory_space<vmem>>, vector<2x32xf32>
      %c0_55 = arith.constant 0 : index
      %c0_56 = arith.constant 0 : index
      %100 = vector.load %arg18[%c0_55, %c0_56] : memref<2x32xf32, #tpu.memory_space<vmem>>, vector<2x32xf32>
      tpu.vector_store %arg18[%c0_55, %c0_56], %99 {strides = array<i32>} : memref<2x32xf32, #tpu.memory_space<vmem>>, vector<2x32xf32>,
      %cst_57 = arith.constant 0.000000e+00 : f32
      %101 = vector.broadcast %cst_57 : f32 to vector<2x16xf32>
      %c0_58 = arith.constant 0 : index
      %c0_59 = arith.constant 0 : index
      %102 = vector.load %arg19[%c0_58, %c0_59] : memref<2x16xf32, #tpu.memory_space<vmem>>, vector<2x16xf32>
      tpu.vector_store %arg19[%c0_58, %c0_59], %101 {strides = array<i32>} : memref<2x16xf32, #tpu.memory_space<vmem>>, vector<2x16xf32>,
    } else {
    }
    %c0 = arith.constant 0 : index
    %c0_1 = arith.constant 0 : index
    %3 = vector.load %arg18[%c0, %c0_1] : memref<2x32xf32, #tpu.memory_space<vmem>>, vector<2x32xf32>
    %c0_2 = arith.constant 0 : index
    %c0_3 = arith.constant 0 : index
    %4 = vector.load %arg19[%c0_2, %c0_3] : memref<2x16xf32, #tpu.memory_space<vmem>>, vector<2x16xf32>
    %c0_4 = arith.constant 0 : index
    %c0_5 = arith.constant 0 : index
    %c0_6 = arith.constant 0 : index
    %5 = vector.load %arg2[%c0_4, %c0_5, %c0_6] : memref<1x2x32xf32, #tpu.memory_space<vmem>>, vector<1x2x32xf32>
    %6 = vector.shape_cast %5 : vector<1x2x32xf32> to vector<2x32xf32>
    %c0_7 = arith.constant 0 : index
    %c0_8 = arith.constant 0 : index
    %7 = vector.load %arg4[%c0_7, %c0_8] : memref<32x128xf32, #tpu.memory_space<vmem>>, vector<32x128xf32>
    %cst = arith.constant dense<0.000000e+00> : vector<2x128xf32>
    %8 = tpu.matmul %3, %7, %cst {dimension_numbers = #tpu.dot_dimension_numbers<[1], [0], [0], [1], [0, 0, 1, 1], [], []>} : vector<2x32xf32>, vector<32x128xf32>, vector<2x128xf32> -> vector<2x128xf32>
    %c0_9 = arith.constant 0 : index
    %c0_10 = arith.constant 0 : index
    %9 = vector.load %arg5[%c0_9, %c0_10] : memref<1x128xf32, #tpu.memory_space<vmem>>, vector<1x128xf32>
    %10 = vector.broadcast %9 : vector<1x128xf32> to vector<2x128xf32>
    %11 = arith.addf %8, %10 : vector<2x128xf32>
    %12 = vector.extract_strided_slice %11 {offsets = [0, 0], sizes = [2, 32], strides = [1, 1]} : vector<2x128xf32> to vector<2x32xf32>
    %13 = vector.extract_strided_slice %11 {offsets = [0, 32], sizes = [2, 96], strides = [1, 1]} : vector<2x128xf32> to vector<2x96xf32>
    %14 = arith.addf %12, %6 : vector<2x32xf32>
    %15 = math.tanh %14 : vector<2x32xf32>
    %c0_11 = arith.constant 0 : index
    %c0_12 = arith.constant 0 : index
    %16 = vector.load %arg6[%c0_11, %c0_12] : memref<32x8xf32, #tpu.memory_space<vmem>>, vector<32x8xf32>
    %cst_13 = arith.constant dense<0.000000e+00> : vector<2x8xf32>
    %17 = tpu.matmul %15, %16, %cst_13 {dimension_numbers = #tpu.dot_dimension_numbers<[1], [0], [0], [1], [0, 0, 1, 1], [], []>} : vector<2x32xf32>, vector<32x8xf32>, vector<2x8xf32> -> vector<2x8xf32>
    %c0_14 = arith.constant 0 : index
    %c0_15 = arith.constant 0 : index
    %18 = vector.load %arg7[%c0_14, %c0_15] : memref<1x8xf32, #tpu.memory_space<vmem>>, vector<1x8xf32>
    %19 = vector.broadcast %18 : vector<1x8xf32> to vector<2x8xf32>
    %20 = arith.addf %17, %19 : vector<2x8xf32>
    %21 = arith.index_cast %arg0 : i32 to index
    %c0_16 = arith.constant 0 : index
    %c0_17 = arith.constant 0 : index
    %22 = vector.load %arg17[%21, %c0_16, %c0_17] : memref<8x2x8xf32, #tpu.memory_space<vmem>>, vector<1x2x8xf32>
    %23 = vector.shape_cast %22 : vector<1x2x8xf32> to vector<2x8xf32>
    %24 = vector.shape_cast %20 : vector<2x8xf32> to vector<1x2x8xf32>
    tpu.vector_store %arg17[%21, %c0_16, %c0_17], %24 {strides = array<i32>} : memref<8x2x8xf32, #tpu.memory_space<vmem>>, vector<1x2x8xf32>,
    %cst_18 = arith.constant dense<0xFF800000> : vector<2xf32>
    %25 = vector.multi_reduction <maximumf>, %20, %cst_18 [1] : vector<2x8xf32> to vector<2xf32>
    %26 = vector.shape_cast %25 : vector<2xf32> to vector<2x1xf32>
    %27 = vector.broadcast %26 : vector<2x1xf32> to vector<2x8xf32>
    %28 = arith.subf %20, %27 : vector<2x8xf32>
    %29 = math.exp %28 : vector<2x8xf32>
    %cst_19 = arith.constant dense<0.000000e+00> : vector<2xf32>
    %30 = vector.multi_reduction <add>, %29, %cst_19 [1] : vector<2x8xf32> to vector<2xf32>
    %31 = vector.shape_cast %30 : vector<2xf32> to vector<2x1xf32>
    %32 = tpu.reciprocal %31 {approx = true} : vector<2x1xf32> -> vector<2x1xf32>
    %33 = vector.broadcast %32 : vector<2x1xf32> to vector<2x8xf32>
    %34 = arith.mulf %29, %33 : vector<2x8xf32>
    %35 = vector.shape_cast %34 : vector<2x8xf32> to vector<2x1x8xf32>
    %c0_20 = arith.constant 0 : index
    %c0_21 = arith.constant 0 : index
    %c0_22 = arith.constant 0 : index
    %36 = vector.load %arg1[%c0_20, %c0_21, %c0_22] : memref<2x8x64xf32, #tpu.memory_space<vmem>>, vector<2x8x64xf32>
    "tpu.trace_start"() <{level = 10 : i32, message = "bqt,btd->bqd"}> : () -> ()
    %cst_23 = arith.constant dense<0.000000e+00> : vector<2x1x64xf32>
    %37 = tpu.matmul %35, %36, %cst_23 {dimension_numbers = #tpu.dot_dimension_numbers<[2], [1], [1], [2], [0, 0, 0, 1, 1, 2], [0], [0]>} : vector<2x1x8xf32>, vector<2x8x64xf32>, vector<2x1x64xf32> -> vector<2x1x64xf32>
    "tpu.trace_stop"() : () -> ()
    %38 = vector.shape_cast %37 : vector<2x1x64xf32> to vector<2x64xf32>
    %39 = tpu.concatenate %4, %38 in 1 : vector<2x16xf32>, vector<2x64xf32> -> vector<2x80xf32>
    %c0_24 = arith.constant 0 : index
    %c0_25 = arith.constant 0 : index
    %40 = vector.load %arg8[%c0_24, %c0_25] : memref<80x96xf32, #tpu.memory_space<vmem>>, vector<80x96xf32>
    %cst_26 = arith.constant dense<0.000000e+00> : vector<2x96xf32>
    %41 = tpu.matmul %39, %40, %cst_26 {dimension_numbers = #tpu.dot_dimension_numbers<[1], [0], [0], [1], [0, 0, 1, 1], [], []>} : vector<2x80xf32>, vector<80x96xf32>, vector<2x96xf32> -> vector<2x96xf32>
    %c0_27 = arith.constant 0 : index
    %c0_28 = arith.constant 0 : index
    %42 = vector.load %arg9[%c0_27, %c0_28] : memref<1x96xf32, #tpu.memory_space<vmem>>, vector<1x96xf32>
    %43 = vector.broadcast %42 : vector<1x96xf32> to vector<2x96xf32>
    %44 = arith.addf %41, %43 : vector<2x96xf32>
    %45 = vector.extract_strided_slice %44 {offsets = [0, 0], sizes = [2, 32], strides = [1, 1]} : vector<2x96xf32> to vector<2x32xf32>
    %46 = vector.extract_strided_slice %13 {offsets = [0, 0], sizes = [2, 32], strides = [1, 1]} : vector<2x96xf32> to vector<2x32xf32>
    %47 = arith.addf %45, %46 : vector<2x32xf32>
    %48 = arith.negf %47 : vector<2x32xf32>
    %49 = math.exp %48 : vector<2x32xf32>
    %cst_29 = arith.constant 1.000000e+00 : f32
    %50 = vector.broadcast %cst_29 : f32 to vector<2x32xf32>
    %51 = arith.addf %50, %49 : vector<2x32xf32>
    %52 = arith.divf %50, %51 : vector<2x32xf32>
    %53 = vector.extract_strided_slice %44 {offsets = [0, 32], sizes = [2, 32], strides = [1, 1]} : vector<2x96xf32> to vector<2x32xf32>
    %54 = vector.extract_strided_slice %13 {offsets = [0, 32], sizes = [2, 32], strides = [1, 1]} : vector<2x96xf32> to vector<2x32xf32>
    %55 = arith.addf %53, %54 : vector<2x32xf32>
    %56 = arith.negf %55 : vector<2x32xf32>
    %57 = math.exp %56 : vector<2x32xf32>
    %cst_30 = arith.constant 1.000000e+00 : f32
    %58 = vector.broadcast %cst_30 : f32 to vector<2x32xf32>
    %59 = arith.addf %58, %57 : vector<2x32xf32>
    %60 = arith.divf %58, %59 : vector<2x32xf32>
    %61 = vector.extract_strided_slice %44 {offsets = [0, 64], sizes = [2, 32], strides = [1, 1]} : vector<2x96xf32> to vector<2x32xf32>
    %62 = vector.extract_strided_slice %13 {offsets = [0, 64], sizes = [2, 32], strides = [1, 1]} : vector<2x96xf32> to vector<2x32xf32>
    %63 = arith.mulf %52, %62 : vector<2x32xf32>
    %64 = arith.addf %61, %63 : vector<2x32xf32>
    %65 = math.tanh %64 : vector<2x32xf32>
    %cst_31 = arith.constant 1.000000e+00 : f32
    %66 = vector.broadcast %cst_31 : f32 to vector<2x32xf32>
    %67 = arith.subf %66, %60 : vector<2x32xf32>
    %68 = arith.mulf %67, %65 : vector<2x32xf32>
    %69 = arith.mulf %60, %3 : vector<2x32xf32>
    %70 = arith.addf %68, %69 : vector<2x32xf32>
    %c0_32 = arith.constant 0 : index
    %c0_33 = arith.constant 0 : index
    %71 = vector.load %arg10[%c0_32, %c0_33] : memref<32x48xf32, #tpu.memory_space<vmem>>, vector<32x48xf32>
    %cst_34 = arith.constant dense<0.000000e+00> : vector<2x48xf32>
    %72 = tpu.matmul %70, %71, %cst_34 {dimension_numbers = #tpu.dot_dimension_numbers<[1], [0], [0], [1], [0, 0, 1, 1], [], []>} : vector<2x32xf32>, vector<32x48xf32>, vector<2x48xf32> -> vector<2x48xf32>
    %c0_35 = arith.constant 0 : index
    %c0_36 = arith.constant 0 : index
    %73 = vector.load %arg11[%c0_35, %c0_36] : memref<1x48xf32, #tpu.memory_space<vmem>>, vector<1x48xf32>
    %74 = vector.broadcast %73 : vector<1x48xf32> to vector<2x48xf32>
    %75 = arith.addf %72, %74 : vector<2x48xf32>
    %76 = vector.extract_strided_slice %75 {offsets = [0, 0], sizes = [2, 16], strides = [1, 1]} : vector<2x48xf32> to vector<2x16xf32>
    %77 = vector.extract_strided_slice %75 {offsets = [0, 16], sizes = [2, 32], strides = [1, 1]} : vector<2x48xf32> to vector<2x32xf32>
    %78 = tpu.concatenate %76, %38 in 1 : vector<2x16xf32>, vector<2x64xf32> -> vector<2x80xf32>
    %c0_37 = arith.constant 0 : index
    %c0_38 = arith.constant 0 : index
    %79 = vector.load %arg12[%c0_37, %c0_38] : memref<80x32xf32, #tpu.memory_space<vmem>>, vector<80x32xf32>
    %cst_39 = arith.constant dense<0.000000e+00> : vector<2x32xf32>
    %80 = tpu.matmul %78, %79, %cst_39 {dimension_numbers = #tpu.dot_dimension_numbers<[1], [0], [0], [1], [0, 0, 1, 1], [], []>} : vector<2x80xf32>, vector<80x32xf32>, vector<2x32xf32> -> vector<2x32xf32>
    %c0_40 = arith.constant 0 : index
    %c0_41 = arith.constant 0 : index
    %81 = vector.load %arg13[%c0_40, %c0_41] : memref<1x32xf32, #tpu.memory_space<vmem>>, vector<1x32xf32>
    %82 = vector.broadcast %81 : vector<1x32xf32> to vector<2x32xf32>
    %83 = arith.addf %80, %82 : vector<2x32xf32>
    %84 = arith.addf %77, %83 : vector<2x32xf32>
    %85 = vector.extract_strided_slice %84 {offsets = [0, 0], sizes = [2, 16], strides = [1, 1]} : vector<2x32xf32> to vector<2x16xf32>
    %86 = vector.extract_strided_slice %84 {offsets = [0, 16], sizes = [2, 16], strides = [1, 1]} : vector<2x32xf32> to vector<2x16xf32>
    %87 = arith.maximumf %85, %86 : vector<2x16xf32>
    %c0_42 = arith.constant 0 : index
    %c0_43 = arith.constant 0 : index
    %88 = vector.load %arg14[%c0_42, %c0_43] : memref<16x32xf32, #tpu.memory_space<vmem>>, vector<16x32xf32>
    %cst_44 = arith.constant dense<0.000000e+00> : vector<2x32xf32>
    %89 = tpu.matmul %87, %88, %cst_44 {dimension_numbers = #tpu.dot_dimension_numbers<[1], [0], [0], [1], [0, 0, 1, 1], [], []>} : vector<2x16xf32>, vector<16x32xf32>, vector<2x32xf32> -> vector<2x32xf32>
    %c0_45 = arith.constant 0 : index
    %c0_46 = arith.constant 0 : index
    %90 = vector.load %arg15[%c0_45, %c0_46] : memref<1x32xf32, #tpu.memory_space<vmem>>, vector<1x32xf32>
    %91 = vector.broadcast %90 : vector<1x32xf32> to vector<2x32xf32>
    %92 = arith.addf %89, %91 : vector<2x32xf32>
    %93 = arith.index_cast %arg0 : i32 to index
    %c0_47 = arith.constant 0 : index
    %c0_48 = arith.constant 0 : index
    %94 = vector.load %arg16[%93, %c0_47, %c0_48] : memref<8x2x32xf32, #tpu.memory_space<vmem>>, vector<1x2x32xf32>
    %95 = vector.shape_cast %94 : vector<1x2x32xf32> to vector<2x32xf32>
    %96 = vector.shape_cast %92 : vector<2x32xf32> to vector<1x2x32xf32>
    tpu.vector_store %arg16[%93, %c0_47, %c0_48], %96 {strides = array<i32>} : memref<8x2x32xf32, #tpu.memory_space<vmem>>, vector<1x2x32xf32>,
    %c0_49 = arith.constant 0 : index
    %c0_50 = arith.constant 0 : index
    %97 = vector.load %arg18[%c0_49, %c0_50] : memref<2x32xf32, #tpu.memory_space<vmem>>, vector<2x32xf32>
    tpu.vector_store %arg18[%c0_49, %c0_50], %70 {strides = array<i32>} : memref<2x32xf32, #tpu.memory_space<vmem>>, vector<2x32xf32>,
    %c0_51 = arith.constant 0 : index
    %c0_52 = arith.constant 0 : index
    %98 = vector.load %arg19[%c0_51, %c0_52] : memref<2x16xf32, #tpu.memory_space<vmem>>, vector<2x16xf32>
    tpu.vector_store %arg19[%c0_51, %c0_52], %76 {strides = array<i32>} : memref<2x16xf32, #tpu.memory_space<vmem>>, vector<2x16xf32>,
    return
  }
  func.func @transform_0(%arg0: i32) -> (i32, i32, i32) {
    %c0_i32 = arith.constant 0 : i32
    %c0_i32_0 = arith.constant 0 : i32
    %c0_i32_1 = arith.constant 0 : i32
    %c0_i32_2 = arith.constant 0 : i32
    return %c0_i32, %c0_i32_0, %c0_i32_1 : i32, i32, i32
  }
  func.func @transform_1(%arg0: i32) -> (i32, i32, i32) {
    %c0_i32 = arith.constant 0 : i32
    %c0_i32_0 = arith.constant 0 : i32
    %c0_i32_1 = arith.constant 0 : i32
    return %arg0, %c0_i32, %c0_i32_0 : i32, i32, i32
  }
  func.func @transform_2(%arg0: i32) -> (i32, i32) {
    %c0_i32 = arith.constant 0 : i32
    %c0_i32_0 = arith.constant 0 : i32
    %c0_i32_1 = arith.constant 0 : i32
    return %c0_i32, %c0_i32_0 : i32, i32
  }
  func.func @transform_3(%arg0: i32) -> (i32, i32) {
    %c0_i32 = arith.constant 0 : i32
    %c0_i32_0 = arith.constant 0 : i32
    %c0_i32_1 = arith.constant 0 : i32
    return %c0_i32, %c0_i32_0 : i32, i32
  }
  func.func @transform_4(%arg0: i32) -> (i32, i32) {
    %c0_i32 = arith.constant 0 : i32
    %c0_i32_0 = arith.constant 0 : i32
    %c0_i32_1 = arith.constant 0 : i32
    return %c0_i32, %c0_i32_0 : i32, i32
  }
  func.func @transform_5(%arg0: i32) -> (i32, i32) {
    %c0_i32 = arith.constant 0 : i32
    %c0_i32_0 = arith.constant 0 : i32
    %c0_i32_1 = arith.constant 0 : i32
    return %c0_i32, %c0_i32_0 : i32, i32
  }
  func.func @transform_6(%arg0: i32) -> (i32, i32) {
    %c0_i32 = arith.constant 0 : i32
    %c0_i32_0 = arith.constant 0 : i32
    %c0_i32_1 = arith.constant 0 : i32
    return %c0_i32, %c0_i32_0 : i32, i32
  }
  func.func @transform_7(%arg0: i32) -> (i32, i32) {
    %c0_i32 = arith.constant 0 : i32
    %c0_i32_0 = arith.constant 0 : i32
    %c0_i32_1 = arith.constant 0 : i32
    return %c0_i32, %c0_i32_0 : i32, i32
  }
  func.func @transform_8(%arg0: i32) -> (i32, i32) {
    %c0_i32 = arith.constant 0 : i32
    %c0_i32_0 = arith.constant 0 : i32
    %c0_i32_1 = arith.constant 0 : i32
    return %c0_i32, %c0_i32_0 : i32, i32
  }
  func.func @transform_9(%arg0: i32) -> (i32, i32) {
    %c0_i32 = arith.constant 0 : i32
    %c0_i32_0 = arith.constant 0 : i32
    %c0_i32_1 = arith.constant 0 : i32
    return %c0_i32, %c0_i32_0 : i32, i32
  }
  func.func @transform_10(%arg0: i32) -> (i32, i32) {
    %c0_i32 = arith.constant 0 : i32
    %c0_i32_0 = arith.constant 0 : i32
    %c0_i32_1 = arith.constant 0 : i32
    return %c0_i32, %c0_i32_0 : i32, i32
  }
  func.func @transform_11(%arg0: i32) -> (i32, i32) {
    %c0_i32 = arith.constant 0 : i32
    %c0_i32_0 = arith.constant 0 : i32
    %c0_i32_1 = arith.constant 0 : i32
    return %c0_i32, %c0_i32_0 : i32, i32
  }
  func.func @transform_12(%arg0: i32) -> (i32, i32) {
    %c0_i32 = arith.constant 0 : i32
    %c0_i32_0 = arith.constant 0 : i32
    %c0_i32_1 = arith.constant 0 : i32
    return %c0_i32, %c0_i32_0 : i32, i32
  }
  func.func @transform_13(%arg0: i32) -> (i32, i32) {
    %c0_i32 = arith.constant 0 : i32
    %c0_i32_0 = arith.constant 0 : i32
    %c0_i32_1 = arith.constant 0 : i32
    return %c0_i32, %c0_i32_0 : i32, i32
  }
  func.func @transform_14(%arg0: i32) -> (i32, i32) {
    %c0_i32 = arith.constant 0 : i32
    %c0_i32_0 = arith.constant 0 : i32
    %c0_i32_1 = arith.constant 0 : i32
    return %c0_i32, %c0_i32_0 : i32, i32
  }
  func.func @transform_15(%arg0: i32) -> (i32, i32, i32) {
    %c0_i32 = arith.constant 0 : i32
    %c0_i32_0 = arith.constant 0 : i32
    %c0_i32_1 = arith.constant 0 : i32
    %c0_i32_2 = arith.constant 0 : i32
    return %c0_i32, %c0_i32_0, %c0_i32_1 : i32, i32, i32
  }
  func.func @transform_16(%arg0: i32) -> (i32, i32, i32) {
    %c0_i32 = arith.constant 0 : i32
    %c0_i32_0 = arith.constant 0 : i32
    %c0_i32_1 = arith.constant 0 : i32
    %c0_i32_2 = arith.constant 0 : i32
    return %c0_i32, %c0_i32_0, %c0_i32_1 : i32, i32, i32
  }
}

</mosaic_0001>

<bundles_post_ra>
// kernel: tpu_custom_call.1
= control target key start
LH: loop header
LB: loop body
LE: loop exit
PB: predicated region body
PF: predicated region fallthrough
CT: control target
= control target key end

     0   :  { %s3420_s0 = inlined_call_operand.hbm [shape: f32[2,8,64], index: 0, kind: input, shape index: {}]   ;;  %s3421_s1 = inlined_call_operand.hbm [shape: f32[8,2,32], index: 1, kind: input, shape index: {}]   ;;  %s3422_s2 = inlined_call_operand.hbm [shape: f32[2,32], index: 2, kind: input, shape index: {}]   ;;  %s3423_s3 = inlined_call_operand.hbm [shape: f32[32,128], index: 3, kind: input, shape index: {}]   ;;  %s3424_s4 = inlined_call_operand.hbm [shape: f32[1,128], index: 4, kind: input, shape index: {}]   ;;  %s3425_s5 = inlined_call_operand.hbm [shape: f32[32,8], index: 5, kind: input, shape index: {}]   ;;  %s3426_s6 = inlined_call_operand.hbm [shape: f32[1,8], index: 6, kind: input, shape index: {}]   ;;  %s3427_s7 = inlined_call_operand.hbm [shape: f32[80,96], index: 7, kind: input, shape index: {}]   ;;  %s3428_s8 = inlined_call_operand.hbm [shape: f32[1,96], index: 8, kind: input, shape index: {}]   ;;  %s3429_s9 = inlined_call_operand.hbm [shape: f32[32,48], index: 9, kind: input, shape index: {}]   ;;  %s3430_s10 = inlined_call_operand.hbm [shape: f32[1,48], index: 10, kind: input, shape index: {}]   ;;  %s3431_s11 = inlined_call_operand.hbm [shape: f32[80,32], index: 11, kind: input, shape index: {}]   ;;  %s3432_s12 = inlined_call_operand.hbm [shape: f32[1,32], index: 12, kind: input, shape index: {}]   ;;  %s3433_s13 = inlined_call_operand.hbm [shape: f32[16,32], index: 13, kind: input, shape index: {}]   ;;  %s3434_s14 = inlined_call_operand.hbm [shape: f32[1,32], index: 14, kind: input, shape index: {}]   ;;  %s3435_s15 = inlined_call_operand.hbm [shape: f32[8,2,32], index: 15, kind: output, shape index: {0}]   ;;  %s3436_s16 = inlined_call_operand.hbm [shape: f32[8,2,8], index: 16, kind: output, shape index: {1}]  }
   0x1   :  { %3447 = sst [smem:[#allocation45_spill]] %s3420_s0 }
   0x2   :  { %3448 = sst [smem:[#allocation46_spill]] %s3421_s1 }
   0x3   :  { %3449 = sst [smem:[#allocation47_spill]] %s3422_s2 }
   0x4   :  { %3450 = sst [smem:[#allocation48_spill]] %s3423_s3 }
   0x5   :  { %3451 = sst [smem:[#allocation49_spill]] %s3425_s5 }
   0x6   :  { %3452 = sst [smem:[#allocation50_spill]] %s3435_s15 }
   0x7   :  { %3453 = sst [smem:[#allocation51_spill]] %s3436_s16 }
   0x8   :  { %22 = vsyncpa [#allocation5], 0 }
   0x9   :  { %23 = vsyncpa [#allocation8], 0 }
   0xa   :  { %25 = vsyncpa [#allocation8 + $0x1], 0 }
   0xb   :  { %26 = vsyncpa [#allocation11], 0 }
   0xc   :  { %27 = vsyncpa [#allocation14], 0 }
   0xd   :  { %28 = vsyncpa [#allocation17], 0 }
   0xe   :  { %29 = vsyncpa [#allocation20], 0 }
   0xf   :  { %30 = vsyncpa [#allocation23], 0 }
  0x10   :  { %31 = vsyncpa [#allocation26], 0 }
  0x11   :  { %32 = vsyncpa [#allocation6], 0 }
  0x12   :  { %33 = vsyncpa [#allocation30], 0  ;;  %s2847_s21 = smov 0   ;;  %s2849_s22 = smov 0  }
  0x13   :  { %s2851_s23 = smov 0   ;;  %s2853_s24 = smov 0  }
  0x14 LB: > { %3454 = sst [smem:[#allocation42_spill]] %s2718_s21  ;;  %s2732_s25 = smov [#allocation9]   ;;  %s2730_s24 = sphi %s2853_s24, %s3496_s24   ;;  %s2726_s23 = sphi %s2851_s23, %s3495_s23   ;;  %s2722_s22 = sphi %s2849_s22, %s3494_s22   ;;  %s2718_s21 = sphi %s2847_s21, %s3493_s21  }
  0x15   : > { %s432_s26 = sshll.u32 %s2732_s25, 4  ;;  %s2868_s27 = sadd.s32 4294967295, %s2730_s24   ;;  %s433_s26 = int_to_ptr.vmem [resolvable:$true] %s432_s26 }
  0x16   : > { %3455 = sst [smem:[#allocation43_spill]] %s2868_s27  ;;  %p1715_p0 = scmp.ge.s32.totalorder %s2730_s24, 1 }
  0x17   : > { %p3441_p1 = scmp.eq.s32.totalorder %s2868_s27, 0  ;;  %p406_p2 = scmp.lt.s32.totalorder %s2730_s24, 9 }
  0x18   : > { %s2733_s29 = smov [#allocation10]   ;;  %s2734_s17 = smov [#allocation13]  }
  0x19   : > { %p2874_p4 = pnand %p1715_p0, %p406_p2  ;;  %s442_s30 = sshll.u32 %s2733_s29, 4  ;;  %s2886_s30 = int_to_ptr.vmem [resolvable:$true] %s442_s30 }
  0x1a   : > { %s466_s18 = sshll.u32 %s2734_s17, 4  ;;  %s3459_s2 = sld [smem:[#allocation47_spill]]  ;;  %s2888_s18 = int_to_ptr.vmem [resolvable:$true] %s466_s18 }
  0x1b   : > { %s3456_s28 = scalar_select %p2874_p4, 1, 0 }
  0x1c   : > { %p2029_p5 = pneg %p2874_p4 }
  0x1d   : > { %3457 = sst [smem:[#allocation44_spill]] %s3456_s28 }
  0x1e   : > { %p2882_p6 = pnand %p2029_p5, %p3441_p1 }
  0x20   : > { %s2182_s25 = scalar_lea.hbm %s3459_s2, 32  ;;  %p2898_p8 = pneg %p2882_p6 }
  0x21   : > { %p2183_p7 = scmp.ne.s32.totalorder %s3459_s2, %s2182_s25  ;;  %p2189_p11 = scmp.lt.u32.totalorder %s2182_s25, %s3459_s2 }
  0x23   : > { %p2185_p9 = pnand %p2898_p8, %p2183_p7 }
  0x25   : > { %p2186_p10 = pneg %p2185_p9 }
  0x27   : > { %p2191_p12 = pnand %p2189_p11, %p2186_p10 }
  0x29   : > { %2194 = shalt.err (!%p2191_p12)
}
  0x2a   : > { %s2195_s19 = scalar_lea.vmem %s433_s26, 32  ;;  %p2203_p5 = scmp.lt.s32.totalorder %s433_s26, %s433_s26 }
  0x2b   : > { %p2196_p13 = scmp.ne.s32.totalorder %s433_s26, %s2195_s19  ;;  %p2204_p3 = scmp.lt.s32.totalorder %s2195_s19, %s2195_s19 }
  0x2d   : > { %p2198_p0 = pnand %p2196_p13, %p2898_p8  ;;  %p2205_p1 = por %p2204_p3, %p2203_p5 }
  0x2f   : > { %p2199_p2 = pneg %p2198_p0 }
  0x31   : > { %p2206_p4 = pnand %p2205_p1, %p2199_p2 }
  0x33   : > { %2209 = shalt.err (!%p2206_p4)
}
  0x34   : > { %2035 = dma.hbm_to_vmem [thread:$0]  (!%p2882_p6), %s3459_s2, 32, %s433_s26, [#allocation8]  }
  0x35   : > { %s3461_s3 = sld [smem:[#allocation48_spill]] }
  0x3b   : > { %s2210_s25 = scalar_lea.hbm %s3461_s3, 512 }
  0x3c   : > { %p2211_p7 = scmp.ne.s32.totalorder %s3461_s3, %s2210_s25  ;;  %p2217_p1 = scmp.lt.u32.totalorder %s2210_s25, %s3461_s3 }
  0x3e   : > { %p2213_p9 = pnand %p2211_p7, %p2898_p8 }
  0x40   : > { %p2214_p3 = pneg %p2213_p9 }
  0x42   : > { %p2219_p4 = pnand %p2217_p1, %p2214_p3 }
  0x44   : > { %2222 = shalt.err (!%p2219_p4)
}
  0x45   : > { %s2223_s26 = scalar_lea.vmem %s2886_s30, 512  ;;  %p2231_p13 = scmp.lt.s32.totalorder %s2886_s30, %s2886_s30 }
  0x46   : > { %p2224_p10 = scmp.ne.s32.totalorder %s2886_s30, %s2223_s26  ;;  %p2232_p0 = scmp.lt.s32.totalorder %s2223_s26, %s2223_s26 }
  0x48   : > { %p2226_p11 = pnand %p2224_p10, %p2898_p8  ;;  %p2233_p2 = por %p2232_p0, %p2231_p13 }
  0x4a   : > { %p2227_p12 = pneg %p2226_p11 }
  0x4c   : > { %p2234_p5 = pnand %p2233_p2, %p2227_p12 }
  0x4e   : > { %2237 = shalt.err (!%p2234_p5)
}
  0x4f   : > { %s2735_s1 = smov 128   ;;  %s2736_s27 = smov 8  }
  0x50   : > { %2038 = dma.hbm_to_vmem [thread:$0]  (!%p2882_p6), %s3461_s3, 512, %s2886_s30, [#allocation11], %s2735_s1, %s2735_s1, %s2736_s27  }
  0x51   : > { %s3462_s5 = sld [smem:[#allocation49_spill]] }
  0x57   : > { %s2238_s25 = scalar_lea.hbm %s3462_s5, 512 }
  0x58   : > { %p2239_p7 = scmp.ne.s32.totalorder %s3462_s5, %s2238_s25  ;;  %p2245_p1 = scmp.lt.u32.totalorder %s2238_s25, %s3462_s5 }
  0x5a   : > { %p2241_p9 = pnand %p2239_p7, %p2898_p8 }
  0x5c   : > { %p2242_p3 = pneg %p2241_p9 }
  0x5e   : > { %p2247_p4 = pnand %p2245_p1, %p2242_p3 }
  0x60   : > { %2250 = shalt.err (!%p2247_p4)
}
  0x61   : > { %s2251_s30 = scalar_lea.vmem %s2888_s18, 512  ;;  %p2259_p13 = scmp.lt.s32.totalorder %s2888_s18, %s2888_s18 }
  0x62   : > { %p2252_p10 = scmp.ne.s32.totalorder %s2888_s18, %s2251_s30  ;;  %p2260_p0 = scmp.lt.s32.totalorder %s2251_s30, %s2251_s30 }
  0x64   : > { %p2254_p11 = pnand %p2252_p10, %p2898_p8  ;;  %p2261_p2 = por %p2260_p0, %p2259_p13 }
  0x66   : > { %p2255_p12 = pneg %p2254_p11 }
  0x68   : > { %p2262_p5 = pnand %p2261_p2, %p2255_p12 }
  0x6a   : > { %2265 = shalt.err (!%p2262_p5)
}
  0x6b   : > { %2044 = dma.hbm_to_vmem [thread:$0]  (!%p2882_p6), %s3462_s5, 512, %s2888_s18, [#allocation14], %s2735_s1, %s2735_s1, %s2736_s27  }
  0x6c   : > { %s2737_s16 = smov [#allocation16]   ;;  %s2738_s20 = smov [#allocation19]  }
  0x6d   : > { %s490_s28 = sshll.u32 %s2737_s16, 4  ;;  %s514_s25 = sshll.u32 %s2738_s20, 4  ;;  %s491_s28 = int_to_ptr.vmem [resolvable:$true] %s490_s28  ;;  %s515_s25 = int_to_ptr.vmem [resolvable:$true] %s514_s25 }
  0x6e   : > { %s2266_s26 = scalar_lea.hbm %s3427_s7, 1280 }
  0x6f   : > { %p2267_p7 = scmp.ne.s32.totalorder %s3427_s7, %s2266_s26  ;;  %p2273_p1 = scmp.lt.u32.totalorder %s2266_s26, %s3427_s7 }
  0x71   : > { %p2269_p9 = pnand %p2267_p7, %p2898_p8 }
  0x73   : > { %p2270_p3 = pneg %p2269_p9 }
  0x75   : > { %p2275_p4 = pnand %p2273_p1, %p2270_p3 }
  0x77   : > { %2278 = shalt.err (!%p2275_p4)
}
  0x78   : > { %s2279_s18 = scalar_lea.vmem %s491_s28, 1280  ;;  %p2287_p13 = scmp.lt.s32.totalorder %s491_s28, %s491_s28 }
  0x79   : > { %p2280_p10 = scmp.ne.s32.totalorder %s491_s28, %s2279_s18  ;;  %p2288_p0 = scmp.lt.s32.totalorder %s2279_s18, %s2279_s18 }
  0x7b   : > { %p2282_p11 = pnand %p2280_p10, %p2898_p8  ;;  %p2289_p2 = por %p2288_p0, %p2287_p13 }
  0x7d   : > { %p2283_p12 = pneg %p2282_p11 }
  0x7f   : > { %p2290_p5 = pnand %p2289_p2, %p2283_p12 }
  0x81   : > { %2293 = shalt.err (!%p2290_p5)
}
  0x82   : > { %2050 = dma.hbm_to_vmem [thread:$0]  (!%p2882_p6), %s3427_s7, 1280, %s491_s28, [#allocation17], %s2735_s1, %s2735_s1, %s2736_s27  }
  0x83   : > { %s2294_s20 = scalar_lea.hbm %s3429_s9, 512 }
  0x84   : > { %p2295_p7 = scmp.ne.s32.totalorder %s3429_s9, %s2294_s20  ;;  %p2301_p1 = scmp.lt.u32.totalorder %s2294_s20, %s3429_s9 }
  0x86   : > { %p2297_p9 = pnand %p2295_p7, %p2898_p8 }
  0x88   : > { %p2298_p3 = pneg %p2297_p9 }
  0x8a   : > { %p2303_p4 = pnand %p2301_p1, %p2298_p3 }
  0x8c   : > { %2306 = shalt.err (!%p2303_p4)
}
  0x8d   : > { %s2307_s2 = scalar_lea.vmem %s515_s25, 512  ;;  %p2315_p13 = scmp.lt.s32.totalorder %s515_s25, %s515_s25 }
  0x8e   : > { %p2308_p10 = scmp.ne.s32.totalorder %s515_s25, %s2307_s2  ;;  %p2316_p0 = scmp.lt.s32.totalorder %s2307_s2, %s2307_s2 }
  0x90   : > { %p2310_p11 = pnand %p2308_p10, %p2898_p8  ;;  %p2317_p2 = por %p2316_p0, %p2315_p13 }
  0x92   : > { %p2311_p12 = pneg %p2310_p11 }
  0x94   : > { %p2318_p5 = pnand %p2317_p2, %p2311_p12 }
  0x96   : > { %2321 = shalt.err (!%p2318_p5)
}
  0x97   : > { %2056 = dma.hbm_to_vmem [thread:$0]  (!%p2882_p6), %s3429_s9, 512, %s515_s25, [#allocation20], %s2735_s1, %s2735_s1, %s2736_s27  }
  0x98   : > { %s2739_s3 = smov [#allocation22]   ;;  %s2740_s15 = smov [#allocation25]  }
  0x99   : > { %s538_s21 = sshll.u32 %s2739_s3, 4  ;;  %s562_s16 = sshll.u32 %s2740_s15, 4  ;;  %s539_s21 = int_to_ptr.vmem [resolvable:$true] %s538_s21  ;;  %s563_s16 = int_to_ptr.vmem [resolvable:$true] %s562_s16 }
  0x9a   : > { %s2322_s19 = scalar_lea.hbm %s3431_s11, 1280 }
  0x9b   : > { %p2323_p7 = scmp.ne.s32.totalorder %s3431_s11, %s2322_s19  ;;  %p2329_p1 = scmp.lt.u32.totalorder %s2322_s19, %s3431_s11 }
  0x9d   : > { %p2325_p9 = pnand %p2323_p7, %p2898_p8 }
  0x9f   : > { %p2326_p3 = pneg %p2325_p9 }
  0xa1   : > { %p2331_p4 = pnand %p2329_p1, %p2326_p3 }
  0xa3   : > { %2334 = shalt.err (!%p2331_p4)
}
  0xa4   : > { %s2335_s25 = scalar_lea.vmem %s539_s21, 1280  ;;  %p2343_p13 = scmp.lt.s32.totalorder %s539_s21, %s539_s21 }
  0xa5   : > { %p2336_p10 = scmp.ne.s32.totalorder %s539_s21, %s2335_s25  ;;  %p2344_p0 = scmp.lt.s32.totalorder %s2335_s25, %s2335_s25 }
  0xa7   : > { %p2338_p11 = pnand %p2336_p10, %p2898_p8  ;;  %p2345_p2 = por %p2344_p0, %p2343_p13 }
  0xa9   : > { %p2339_p12 = pneg %p2338_p11 }
  0xab   : > { %p2346_p5 = pnand %p2345_p2, %p2339_p12 }
  0xad   : > { %2349 = shalt.err (!%p2346_p5)
}
  0xae   : > { %2062 = dma.hbm_to_vmem [thread:$0]  (!%p2882_p6), %s3431_s11, 1280, %s539_s21, [#allocation23], %s2735_s1, %s2735_s1, %s2736_s27  }
  0xaf   : > { %s2350_s17 = scalar_lea.hbm %s3433_s13, 256 }
  0xb0   : > { %p2351_p7 = scmp.ne.s32.totalorder %s3433_s13, %s2350_s17  ;;  %p2357_p1 = scmp.lt.u32.totalorder %s2350_s17, %s3433_s13 }
  0xb2   : > { %p2353_p9 = pnand %p2351_p7, %p2898_p8 }
  0xb4   : > { %p2354_p3 = pneg %p2353_p9 }
  0xb6   : > { %p2359_p4 = pnand %p2357_p1, %p2354_p3 }
  0xb8   : > { %2362 = shalt.err (!%p2359_p4)
}
  0xb9   : > { %s2363_s28 = scalar_lea.vmem %s563_s16, 256  ;;  %p2371_p13 = scmp.lt.s32.totalorder %s563_s16, %s563_s16 }
  0xba   : > { %p2364_p10 = scmp.ne.s32.totalorder %s563_s16, %s2363_s28  ;;  %p2372_p0 = scmp.lt.s32.totalorder %s2363_s28, %s2363_s28 }
  0xbc   : > { %p2366_p11 = pnand %p2364_p10, %p2898_p8  ;;  %p2373_p2 = por %p2372_p0, %p2371_p13 }
  0xbe   : > { %p2367_p12 = pneg %p2366_p11 }
  0xc0   : > { %p2374_p5 = pnand %p2373_p2, %p2367_p12 }
  0xc2   : > { %2377 = shalt.err (!%p2374_p5)
}
  0xc3   : > { %2068 = dma.hbm_to_vmem [thread:$0]  (!%p2882_p6), %s3433_s13, 256, %s563_s16, [#allocation26], %s2735_s1, %s2735_s1, %s2736_s27  }
  0xc4   : > { %s2741_s18 = smov [#allocation4]   ;;  %s2742_s15 = smov [#allocation12]  }
  0xc5   : > { %s418_s3 = sshll.u32 %s2741_s18, 4  ;;  %s456_s20 = sshll.u32 %s2742_s15, 4  ;;  %s419_s3 = int_to_ptr.vmem [resolvable:$true] %s418_s3  ;;  %s457_s20 = int_to_ptr.vmem [resolvable:$true] %s456_s20 }
  0xc6   : > { %s3463_s26 = sld [smem:[#allocation45_spill]] }
  0xcc   : > { %s2378_s30 = scalar_lea.hbm %s3463_s26, 256 }
  0xcd   : > { %p2379_p7 = scmp.ne.s32.totalorder %s3463_s26, %s2378_s30  ;;  %p2385_p1 = scmp.lt.u32.totalorder %s2378_s30, %s3463_s26 }
  0xcf   : > { %p2381_p9 = pnand %p2379_p7, %p2898_p8 }
  0xd1   : > { %p2382_p3 = pneg %p2381_p9 }
  0xd3   : > { %p2387_p4 = pnand %p2385_p1, %p2382_p3 }
  0xd5   : > { %2390 = shalt.err (!%p2387_p4)
}
  0xd6   : > { %s2391_s16 = scalar_lea.vmem %s419_s3, 256  ;;  %p2399_p13 = scmp.lt.s32.totalorder %s419_s3, %s419_s3 }
  0xd7   : > { %p2392_p10 = scmp.ne.s32.totalorder %s419_s3, %s2391_s16  ;;  %p2400_p0 = scmp.lt.s32.totalorder %s2391_s16, %s2391_s16 }
  0xd9   : > { %p2394_p11 = pnand %p2392_p10, %p2898_p8  ;;  %p2401_p2 = por %p2400_p0, %p2399_p13 }
  0xdb   : > { %p2395_p12 = pneg %p2394_p11 }
  0xdd   : > { %p2402_p5 = pnand %p2401_p2, %p2395_p12 }
  0xdf   : > { %2405 = shalt.err (!%p2402_p5)
}
  0xe0   : > { %2032 = dma.hbm_to_vmem [thread:$0]  (!%p2882_p6), %s3463_s26, 256, %s419_s3, [#allocation5], %s2735_s1, %s2735_s1, %s2736_s27  }
  0xe1   : > { %s2406_s17 = scalar_lea.hbm %s3424_s4, 16 }
  0xe2   : > { %p2407_p7 = scmp.ne.s32.totalorder %s3424_s4, %s2406_s17  ;;  %p2413_p1 = scmp.lt.u32.totalorder %s2406_s17, %s3424_s4 }
  0xe4   : > { %p2409_p9 = pnand %p2407_p7, %p2898_p8 }
  0xe6   : > { %p2410_p3 = pneg %p2409_p9 }
  0xe8   : > { %p2415_p4 = pnand %p2413_p1, %p2410_p3 }
  0xea   : > { %2418 = shalt.err (!%p2415_p4)
}
  0xeb   : > { %s2419_s21 = scalar_lea.vmem %s457_s20, 16  ;;  %s2426_s1 = scalar_lea.vmem %s457_s20, 32 }
  0xec   : > { %p2420_p10 = scmp.ne.s32.totalorder %s457_s20, %s2419_s21  ;;  %p2427_p13 = scmp.lt.s32.totalorder %s457_s20, %s457_s20 }
  0xed   : > { %p2428_p0 = scmp.lt.s32.totalorder %s2426_s1, %s2419_s21 }
  0xee   : > { %p2422_p11 = pnand %p2420_p10, %p2898_p8 }
  0xef   : > { %p2429_p2 = por %p2428_p0, %p2427_p13 }
  0xf0   : > { %p2423_p12 = pneg %p2422_p11 }
  0xf2   : > { %p2430_p5 = pnand %p2429_p2, %p2423_p12 }
  0xf4   : > { %2433 = shalt.err (!%p2430_p5)
}
  0xf5   : > { %2041 = dma.hbm_to_vmem [thread:$0]  (!%p2882_p6), %s3424_s4, 16, %s457_s20, [#allocation11]  }
  0xf6   : > { %s2743_s16 = smov [#allocation15]   ;;  %s2744_s25 = smov [#allocation18]  }
  0xf7   : > { %s480_s5 = sshll.u32 %s2743_s16, 4  ;;  %s504_s18 = sshll.u32 %s2744_s25, 4  ;;  %s481_s5 = int_to_ptr.vmem [resolvable:$true] %s480_s5  ;;  %s505_s18 = int_to_ptr.vmem [resolvable:$true] %s504_s18 }
  0xf8   : > { %s2434_s19 = scalar_lea.hbm %s3426_s6, 16 }
  0xf9   : > { %p2435_p7 = scmp.ne.s32.totalorder %s3426_s6, %s2434_s19  ;;  %p2441_p1 = scmp.lt.u32.totalorder %s2434_s19, %s3426_s6 }
  0xfb   : > { %p2437_p9 = pnand %p2435_p7, %p2898_p8 }
  0xfd   : > { %p2438_p3 = pneg %p2437_p9 }
  0xff   : > { %p2443_p4 = pnand %p2441_p1, %p2438_p3 }
 0x101   : > { %2446 = shalt.err (!%p2443_p4)
}
 0x102   : > { %s2447_s20 = scalar_lea.vmem %s481_s5, 16  ;;  %s2454_s1 = scalar_lea.vmem %s481_s5, 32 }
 0x103   : > { %p2448_p10 = scmp.ne.s32.totalorder %s481_s5, %s2447_s20  ;;  %p2455_p13 = scmp.lt.s32.totalorder %s481_s5, %s481_s5 }
 0x104   : > { %p2456_p0 = scmp.lt.s32.totalorder %s2454_s1, %s2447_s20 }
 0x105   : > { %p2450_p11 = pnand %p2448_p10, %p2898_p8 }
 0x106   : > { %p2457_p2 = por %p2456_p0, %p2455_p13 }
 0x107   : > { %p2451_p12 = pneg %p2450_p11 }
 0x109   : > { %p2458_p5 = pnand %p2457_p2, %p2451_p12 }
 0x10b   : > { %2461 = shalt.err (!%p2458_p5)
}
 0x10c   : > { %2047 = dma.hbm_to_vmem [thread:$0]  (!%p2882_p6), %s3426_s6, 16, %s481_s5, [#allocation14]  }
 0x10d   : > { %s2462_s15 = scalar_lea.hbm %s3428_s8, 16 }
 0x10e   : > { %p2463_p7 = scmp.ne.s32.totalorder %s3428_s8, %s2462_s15  ;;  %p2469_p1 = scmp.lt.u32.totalorder %s2462_s15, %s3428_s8 }
 0x110   : > { %p2465_p9 = pnand %p2463_p7, %p2898_p8 }
 0x112   : > { %p2466_p3 = pneg %p2465_p9 }
 0x114   : > { %p2471_p4 = pnand %p2469_p1, %p2466_p3 }
 0x116   : > { %2474 = shalt.err (!%p2471_p4)
}
 0x117   : > { %s2475_s28 = scalar_lea.vmem %s505_s18, 16  ;;  %s2482_s5 = scalar_lea.vmem %s505_s18, 32 }
 0x118   : > { %p2476_p10 = scmp.ne.s32.totalorder %s505_s18, %s2475_s28  ;;  %p2483_p13 = scmp.lt.s32.totalorder %s505_s18, %s505_s18 }
 0x119   : > { %p2484_p0 = scmp.lt.s32.totalorder %s2482_s5, %s2475_s28 }
 0x11a   : > { %p2478_p11 = pnand %p2476_p10, %p2898_p8 }
 0x11b   : > { %p2485_p2 = por %p2484_p0, %p2483_p13 }
 0x11c   : > { %p2479_p12 = pneg %p2478_p11 }
 0x11e   : > { %p2486_p5 = pnand %p2485_p2, %p2479_p12 }
 0x120   : > { %2489 = shalt.err (!%p2486_p5)
}
 0x121   : > { %2053 = dma.hbm_to_vmem [thread:$0]  (!%p2882_p6), %s3428_s8, 16, %s505_s18, [#allocation17]  }
 0x122   : > { %s2745_s1 = smov [#allocation21]   ;;  %s2746_s3 = smov [#allocation24]  }
 0x123   : > { %s528_s27 = sshll.u32 %s2745_s1, 4  ;;  %s552_s16 = sshll.u32 %s2746_s3, 4  ;;  %s529_s27 = int_to_ptr.vmem [resolvable:$true] %s528_s27  ;;  %s553_s16 = int_to_ptr.vmem [resolvable:$true] %s552_s16 }
 0x124   : > { %s2490_s17 = scalar_lea.hbm %s3430_s10, 16 }
 0x125   : > { %p2491_p7 = scmp.ne.s32.totalorder %s3430_s10, %s2490_s17  ;;  %p2497_p1 = scmp.lt.u32.totalorder %s2490_s17, %s3430_s10 }
 0x127   : > { %p2493_p9 = pnand %p2491_p7, %p2898_p8 }
 0x129   : > { %p2494_p3 = pneg %p2493_p9 }
 0x12b   : > { %p2499_p4 = pnand %p2497_p1, %p2494_p3 }
 0x12d   : > { %2502 = shalt.err (!%p2499_p4)
}
 0x12e   : > { %s2503_s18 = scalar_lea.vmem %s529_s27, 16  ;;  %s2510_s5 = scalar_lea.vmem %s529_s27, 32 }
 0x12f   : > { %p2504_p10 = scmp.ne.s32.totalorder %s529_s27, %s2503_s18  ;;  %p2511_p13 = scmp.lt.s32.totalorder %s529_s27, %s529_s27 }
 0x130   : > { %p2512_p0 = scmp.lt.s32.totalorder %s2510_s5, %s2503_s18 }
 0x131   : > { %p2506_p11 = pnand %p2504_p10, %p2898_p8 }
 0x132   : > { %p2513_p2 = por %p2512_p0, %p2511_p13 }
 0x133   : > { %p2507_p12 = pneg %p2506_p11 }
 0x135   : > { %p2514_p5 = pnand %p2513_p2, %p2507_p12 }
 0x137   : > { %2517 = shalt.err (!%p2514_p5)
}
 0x138   : > { %2059 = dma.hbm_to_vmem [thread:$0]  (!%p2882_p6), %s3430_s10, 16, %s529_s27, [#allocation20]  }
 0x139   : > { %s2518_s25 = scalar_lea.hbm %s3432_s12, 16 }
 0x13a   : > { %p2519_p7 = scmp.ne.s32.totalorder %s3432_s12, %s2518_s25  ;;  %p2525_p1 = scmp.lt.u32.totalorder %s2518_s25, %s3432_s12 }
 0x13c   : > { %p2521_p9 = pnand %p2519_p7, %p2898_p8 }
 0x13e   : > { %p2522_p3 = pneg %p2521_p9 }
 0x140   : > { %p2527_p4 = pnand %p2525_p1, %p2522_p3 }
 0x142   : > { %2530 = shalt.err (!%p2527_p4)
}
 0x143   : > { %s2531_s2 = scalar_lea.vmem %s553_s16, 16  ;;  %s2538_s27 = scalar_lea.vmem %s553_s16, 32 }
 0x144   : > { %p2532_p10 = scmp.ne.s32.totalorder %s553_s16, %s2531_s2  ;;  %p2539_p13 = scmp.lt.s32.totalorder %s553_s16, %s553_s16 }
 0x145   : > { %p2540_p0 = scmp.lt.s32.totalorder %s2538_s27, %s2531_s2 }
 0x146   : > { %p2534_p11 = pnand %p2532_p10, %p2898_p8 }
 0x147   : > { %p2541_p2 = por %p2540_p0, %p2539_p13 }
 0x148   : > { %p2535_p12 = pneg %p2534_p11 }
 0x14a   : > { %p2542_p5 = pnand %p2541_p2, %p2535_p12 }
 0x14c   : > { %2545 = shalt.err (!%p2542_p5)
}
 0x14d   : > { %2065 = dma.hbm_to_vmem [thread:$0]  (!%p2882_p6), %s3432_s12, 16, %s553_s16, [#allocation23]  }
 0x14e   : > { %s2747_s5 = smov [#allocation27]   ;;  %s2546_s3 = scalar_lea.hbm %s3434_s14, 16 }
 0x14f   : > { %s576_s21 = sshll.u32 %s2747_s5, 4  ;;  %p2547_p7 = scmp.ne.s32.totalorder %s3434_s14, %s2546_s3  ;;  %s577_s21 = int_to_ptr.vmem [resolvable:$true] %s576_s21 }
 0x150   : > { %p2553_p1 = scmp.lt.u32.totalorder %s2546_s3, %s3434_s14 }
 0x151   : > { %p2549_p9 = pnand %p2547_p7, %p2898_p8 }
 0x153   : > { %p2550_p3 = pneg %p2549_p9 }
 0x155   : > { %p2555_p4 = pnand %p2553_p1, %p2550_p3 }
 0x157   : > { %2558 = shalt.err (!%p2555_p4)
}
 0x158   : > { %s2559_s16 = scalar_lea.vmem %s577_s21, 16  ;;  %s2566_s30 = scalar_lea.vmem %s577_s21, 32 }
 0x159   : > { %p2560_p10 = scmp.ne.s32.totalorder %s577_s21, %s2559_s16  ;;  %p2567_p13 = scmp.lt.s32.totalorder %s577_s21, %s577_s21 }
 0x15a   : > { %p2568_p0 = scmp.lt.s32.totalorder %s2566_s30, %s2559_s16 }
 0x15b   : > { %p2562_p11 = pnand %p2560_p10, %p2898_p8 }
 0x15c   : > { %p2569_p2 = por %p2568_p0, %p2567_p13 }
 0x15d   : > { %p2563_p12 = pneg %p2562_p11 }
 0x15f   : > { %p2570_p5 = pnand %p2569_p2, %p2563_p12 }
 0x161   : > { %2573 = shalt.err (!%p2570_p5)
}
 0x162   : > { %s3464_s29 = sld [smem:[#allocation42_spill]]  ;;  %s3465_s28 = sld [smem:[#allocation43_spill]] }
 0x163   : > { %2071 = dma.hbm_to_vmem [thread:$0]  (!%p2882_p6), %s3434_s14, 16, %s577_s21, [#allocation26]  }
 0x164   : > { %s3180_s18 = sadd.s32 1, %s2730_s24   ;;  %s67_s0 = sadd.s32 1, %s2726_s23 }
 0x165   : > { %s64_s5 = ssub.s32 %s2730_s24, %s3180_s18  ;;  %p74_p8 = scmp.ne.s32.totalorder %s2726_s23, %s2722_s22 }
 0x166   : > { %p65_p7 = scmp.eq.s32.totalorder %s64_s5, 0  ;;  %p75_p9 = scmp.eq.s32.totalorder %s2730_s24, 0 }
 0x167   : > { %p2090_p1 = scmp.lt.s32.totalorder %s2730_s24, 8  ;;  %s587_s3 = sand.u32 1, %s2730_s24  }
 0x168   : > { %p80_p3 = scmp.ne.s32.totalorder %s2722_s22, %s3464_s29  ;;  %p76_p4 = por %p75_p9, %p74_p8 }
 0x169   : > { %s3192_s20 = scalar_select %p65_p7, %s2726_s23, %s67_s0  }
 0x16a   : > { %p3466_p10 = scmp.eq.s32.totalorder %s3465_s28, 0  ;;  %s589_s21 = sand.u32 1, %s2726_s23  }
 0x16b   : > { %s1731_s25 = sshll.u32 %s589_s21, 1  ;;  %s1732_s15 = sshll.u32 %s2730_s24, 5 }
 0x16c   : > { %p3196_p11 = por %p3466_p10, %p80_p3  ;;  %s3468_s16 = sld [smem:[#allocation46_spill]] }
 0x16d   : > { %s591_s2 = scalar_lea.vmem [#allocation7], %s1731_s25  ;;  %p3210_p6 = pnand %p2090_p1, %p76_p4 }
 0x16e   : > { %s598_s27 = sshll.u32 %s591_s2, 4  ;;  %s588_s24 = scalar_lea.sflag [#allocation8], %s587_s3  ;;  %s3208_s27 = int_to_ptr.vmem [resolvable:$true] %s598_s27 }
 0x16f   : > { %p2576_p13 = pneg %p3210_p6 }
 0x172   : > { %s3206_s30 = scalar_lea.hbm %s3468_s16, %s1732_s15  ;;  %s2579_s21 = scalar_lea.hbm %s3468_s16, 256 }
 0x173   : > { %s2574_s28 = scalar_lea.hbm %s3206_s30, 32  ;;  %p2580_p5 = scmp.lt.u32.totalorder %s3206_s30, %s3468_s16 }
 0x174   : > { %p2575_p12 = scmp.ne.s32.totalorder %s3206_s30, %s2574_s28  ;;  %p2581_p8 = scmp.lt.u32.totalorder %s2579_s21, %s2574_s28 }
 0x175   : > { %p2583_p9 = scmp.lt.u32.totalorder %s2574_s28, %s3206_s30 }
 0x176   : > { %p2577_p0 = pnand %p2576_p13, %p2575_p12  ;;  %p2582_p7 = por %p2581_p8, %p2580_p5 }
 0x178   : > { %p2578_p2 = pneg %p2577_p0  ;;  %p2584_p3 = por %p2583_p9, %p2582_p7 }
 0x17a   : > { %p2585_p1 = pnand %p2584_p3, %p2578_p2 }
 0x17c   : > { %2588 = shalt.err (!%p2585_p1)
}
 0x17d   : > { %s2589_s3 = scalar_lea.vmem %s3208_s27, 32  ;;  %s2748_s17 = smov [#allocation7]  }
 0x17e   : > { %p2590_p4 = scmp.ne.s32.totalorder %s3208_s27, %s2589_s3  ;;  %s2594_s19 = sshll.u32 %s2748_s17, 4  ;;  %s2595_s19 = int_to_ptr.vmem [resolvable:$false] %s2594_s19 }
 0x17f   : > { %s2596_s2 = scalar_lea.vmem %s2595_s19, 64  ;;  %p2597_p0 = scmp.lt.s32.totalorder %s3208_s27, %s2595_s19 }
 0x180   : > { %p2592_p10 = pnand %p2590_p4, %p2576_p13  ;;  %p2598_p5 = scmp.lt.s32.totalorder %s2596_s2, %s2589_s3 }
 0x182   : > { %p2593_p12 = pneg %p2592_p10  ;;  %p2599_p8 = por %p2598_p5, %p2597_p0 }
 0x184   : > { %p2600_p7 = pnand %p2599_p8, %p2593_p12 }
 0x186   : > { %2603 = shalt.err (!%p2600_p7)
}
 0x187   : > { %2075 = dma.hbm_to_vmem [thread:$0]  (!%p3210_p6), %s3206_s30, 32, %s3208_s27, %s588_s24  }
 0x188   : > { %s3470_s28 = sld [smem:[#allocation44_spill]] }
 0x18e   : > { %p3471_p2 = scmp.ne.s32.totalorder %s3470_s28, 0 }
 0x18f   : > { %s3472_s0 = sld [smem:[#allocation43_spill]] (!%p3471_p2) }
 0x190   : > { %607 = sbr.rel (%p3471_p2) target bundleno = 3171 (0xc63), region = 80 }
 0x195   : > { %p3473_p13 = scmp.eq.s32.totalorder (!%p3471_p2), %s3472_s0, 0 }
 0x197   : > { %2673 = dma.done.wait (%p3473_p13), [#allocation5], 256   ;;  %p3474_p9 = pmov %p3473_p13 }
 0x198   : > { %s613_s5 = sand.u32 1, %s3472_s0   ;;  %s615_s21 = sand.u32 1, %s2722_s22  }
 0x199   : > { %2675 = vsyncadd (%p3474_p9), [#allocation5], 4294967040  ;;  %s3247_s25 = sshll.u32 %s615_s21, 1  ;;  %s614_s29 = scalar_lea.sflag [#allocation8], %s613_s5 }
 0x19a   : > { %s617_s15 = scalar_lea.vmem [#allocation7], %s3247_s25 }
 0x19b   : > { %2677 = dma.done.wait (%p3196_p11), %s614_s29, 32  }
 0x19c   : > { %2679 = vsyncadd (%p3196_p11), %s614_s29, 4294967264  ;;  %p3475_p6 = pmov %p3474_p9 }
 0x19e   : > { %2681 = dma.done.wait (%p3475_p6), [#allocation8], 32   ;;  %p3476_p3 = pmov %p3475_p6 }
 0x1a0   : > { %2683 = vsyncadd (%p3476_p3), [#allocation8], 4294967264  ;;  %p3477_p1 = pmov %p3476_p3 }
 0x1a2   : > { %2685 = dma.done.wait (%p3477_p1), [#allocation11], 528   ;;  %p3478_p4 = pmov %p3477_p1 }
 0x1a3   : > { %p3479_p10 = pmov %p3477_p1 }
 0x1a4   : > { %2687 = vsyncadd (%p3478_p4), [#allocation11], 4294966768 }
 0x1a5   : > { %2689 = dma.done.wait (%p3479_p10), [#allocation14], 528   ;;  %p3480_p12 = pmov %p3477_p1 }
 0x1a6   : > { %p3481_p11 = pmov %p3477_p1 }
 0x1a7   : > { %2691 = vsyncadd (%p3480_p12), [#allocation14], 4294966768 }
 0x1a8   : > { %2693 = dma.done.wait (%p3481_p11), [#allocation17], 1296   ;;  %p3482_p0 = pmov %p3477_p1 }
 0x1aa   : > { %2695 = vsyncadd (%p3482_p0), [#allocation17], 4294966000  ;;  %p3483_p5 = pmov %p3482_p0 }
 0x1ab   : > { %p3484_p8 = pmov %p3482_p0 }
 0x1ac   : > { %2697 = dma.done.wait (%p3483_p5), [#allocation20], 528  }
 0x1ad   : > { %2699 = vsyncadd (%p3484_p8), [#allocation20], 4294966768  ;;  %p3485_p7 = pmov %p3482_p0 }
 0x1ae   : > { %p3486_p2 = pmov %p3482_p0 }
 0x1af   : > { %2701 = dma.done.wait (%p3485_p7), [#allocation23], 1296  }
 0x1b0   : > { %2703 = vsyncadd (%p3486_p2), [#allocation23], 4294966000  ;;  %p3487_p13 = pmov %p3482_p0 }
 0x1b1   : > { %p3488_p9 = pmov %p3482_p0 }
 0x1b2   : > { %2705 = dma.done.wait (%p3487_p13), [#allocation26], 272  }
 0x1b3   : > { %2707 = vsyncadd (%p3488_p9), [#allocation26], 4294967024  ;;  %p3489_p6 = scmp.ne.s32.totalorder %s3472_s0, 0 }
 0x1b4   : > { %v717_v0 = vld [vmem:[#allocation9] sm:$0x3] (!%p3489_p6)  ;;  %vm718_vm0 = vcmask (!%p3489_p6), 254976   ;;  %vm720_vm1 = vcmask (!%p3489_p6), 123904   ;;  %v2749_v1 = vmov (!%p3489_p6), 0.0  }
 0x1b5   : > { %716 = sbr.rel (%p3489_p6) target bundleno = 444 (0x1bc), region = 144  ;;  %719 = vst.msk [vmem:[#allocation2] sm:$0x3] (!%p3489_p6), %vm718_vm0, %v717_v0 }
 0x1b6   : > { %721 = vst.msk [vmem:[#allocation3] sm:$0x3] (!%p3489_p6), %vm720_vm1, %v2749_v1 }
 0x1bc PF: > { %v725_v2 = vld [vmem:[#allocation10] sm:$0xff]  ;;  %v726_v3 = vld [vmem:[#allocation10 + $0x8] sm:$0xff]  ;;  %v727_v4 = vld [vmem:[#allocation10 + $0x10] sm:$0xff]  ;;  %v2750_v5 = vmov 0.0|0.0   ;;  %vm2751_vm2 = vmmov 0   ;;  %v2752_v8 = vmov 0.0   ;;  %v915_v39 = vlaneseq }
 0x1bd   : > { %1912 = vmatprep.subr.bf16.mxu0 %v2750_v5  ;;  %v1913_v6 = vpack.c.bf16 %v726_v3, %v725_v2  ;;  %v728_v7 = vld [vmem:[#allocation10 + $0x18] sm:$0xff]  ;;  %1824 = vmatprep.mubr.msk.f32.mxu0 %vm2751_vm2, %v2752_v8  ;;  %v3291_v10 = vld [vmem:[#allocation2] sm:$0x3]  ;;  %vm736_vm3 = vcmask 261120   ;;  %v813_v12 = vld [vmem:[#allocation13 + $0x8] sm:$0xff]  ;;  %s3490_s1 = sld [smem:[#allocation43_spill]] }
 0x1be   : > { %1918 = vmatprep.subr.bf16.mxu1 %v2750_v5  ;;  %1835 = vmatprep.mubr.msk.f32.mxu1 %vm2751_vm2, %v2752_v8  ;;  %v1916_v9 = vpack.c.bf16 %v728_v7, %v727_v4  ;;  %v812_v11 = vld [vmem:[#allocation13] sm:$0xff]  ;;  %v814_v13 = vld [vmem:[#allocation13 + $0x10] sm:$0xff]  ;;  %v815_v15 = vld [vmem:[#allocation13 + $0x18] sm:$0xff]  ;;  %vm898_vm4 = vcmask 58368   ;;  %s2753_s24 = smov 32   ;;  %v916_v41 = vshrl.u32 %v915_v39, 7 }
 0x1bf   : > { %1914 = vmatpush3.bf16.msra.mxu0 %v1913_v6  ;;  %v1919_v14 = vpack.c.bf16 %v813_v12, %v812_v11  ;;  %v1922_v16 = vpack.c.bf16 %v815_v15, %v814_v13  ;;  %v1750_v17 = vld [vmem:[#allocation12] ss:$0 sm:$0xff]  ;;  %v724_v18 = vld [vmem:[%s617_s15] sm:$0x3]  ;;  %v1752_v24 = vld [vmem:[#allocation15] ss:$0 sm:$0xff] }
 0x1c0   : > { %1915 = vmatprep.subr.bf16.mxu0 %v2750_v5  ;;  %v935_v34 = vld [vmem:[#allocation4 + $0x8] sm:$0xff]  ;;  %v934_v35 = vld [vmem:[#allocation4] sm:$0xff]  ;;  %v2754_v37 = vmov 1966171168   ;;  %vm936_vm5 = vcmask 64512   ;;  %v1094_v53 = vld [vmem:[#allocation16 + $0x18] sm:$0xff] }
 0x1c1   : > { %1920 = vmatpush3.bf16.msra.mxu1 %v1919_v14  ;;  %v913_v38 = vunpack.c.l.s4 %v2754_v37  ;;  %v1091_v49 = vld [vmem:[#allocation16] sm:$0xff]  ;;  %v1092_v50 = vld [vmem:[#allocation16 + $0x8] sm:$0xff]  ;;  %v1093_v51 = vld [vmem:[#allocation16 + $0x10] sm:$0xff]  ;;  %vm1084_vm6 = vcmask 1041409   ;;  %s2755_s3 = smov 16   ;;  %s2756_s17 = smov 96  }
 0x1c2   : > { %1921 = vmatprep.subr.bf16.mxu1 %v2750_v5  ;;  %v1925_v52 = vpack.c.bf16 %v1092_v50, %v1091_v49  ;;  %v1928_v54 = vpack.c.bf16 %v1094_v53, %v1093_v51  ;;  %v1095_v55 = vld [vmem:[#allocation16 + $0x20] sm:$0xff]  ;;  %v1096_v56 = vld [vmem:[#allocation16 + $0x28] sm:$0xff]  ;;  %v1097_v58 = vld [vmem:[#allocation16 + $0x30] sm:$0xff]  ;;  %vm1089_vm7 = vcmask 130048   ;;  %vm1108_vm8 = vcmask 654336   ;;  %s2757_s19 = smov 64  }
 0x1c3   : > { %1917 = vmatpush3.bf16.msra.mxu0 %v1916_v9  ;;  %s1754_s30 = sshll.u32 %s3490_s1, 1  ;;  %v914_v40 = vunpack.c.0.s8 %v913_v38  ;;  %v1931_v57 = vpack.c.bf16 %v1096_v56, %v1095_v55  ;;  %v1098_v59 = vld [vmem:[#allocation16 + $0x38] sm:$0xff]  ;;  %v1099_v61 = vld [vmem:[#allocation16 + $0x40] sm:$0xff]  ;;  %v1100_v62 = vld [vmem:[#allocation16 + $0x48] sm:$0xff]  ;;  %vm1486_vm9 = vcmask 254976   ;;  %vm1490_vm10 = vcmask 123904  }
 0x1c4   : > { %1838 = vmatprep.subr.mxu0 %v2752_v8  ;;  %s897_s27 = scalar_lea.vmem [#allocation29], %s1754_s30  ;;  %v1934_v60 = vpack.c.bf16 %v1098_v59, %v1097_v58  ;;  %v1937_v63 = vpack.c.bf16 %v1100_v62, %v1099_v61  ;;  %v723_v7 = vld [vmem:[#allocation3] sm:$0x3]  ;;  %v1757_v12 = vld [vmem:[#allocation18] ss:$0 sm:$0xff]  ;;  %v1301_v39 = vld [vmem:[#allocation22] sm:$0xff] }
 0x1c5   : > { %1923 = vmatpush3.bf16.msra.mxu1 %v1922_v16  ;;  %v917_v42 = vsub.s32 %v914_v40, %v916_v41  ;;  %v1302_v40 = vld [vmem:[#allocation22 + $0x8] sm:$0xff]  ;;  %v1308_v49 = vld [vmem:[#allocation22 + $0x38] sm:$0xff]  ;;  %v1309_v51 = vld [vmem:[#allocation22 + $0x40] sm:$0xff]  ;;  %s2758_s2 = smov 112   ;;  %p2105_p3 = scmp.eq.s32.totalorder %s3490_s1, 7 }
 0x1c6   : > { %1825 = vmatmul.mubr.msk.f32.vlgmr.msra.gmra.mrb[0].mxu0 %vm736_vm3, %v3291_v10  ;;  %1843 = vmatprep.subr.mxu1 %v2752_v8  ;;  %v1946_v41 = vpack.c.bf16 %v1302_v40, %v1301_v39  ;;  %v1760_v53 = vld [vmem:[#allocation21] ss:$0 sm:$0xff]  ;;  %v1762_v58 = vld [vmem:[#allocation24] ss:$0 sm:$0xff]  ;;  %v1401_v61 = vld [vmem:[#allocation25] sm:$0xff]  ;;  %s2759_s28 = smov [#allocation29]  }
 0x1c7   : > { %1840 = vmatprep.mubr.msk.f32.mxu0 %vm2751_vm2, %v2752_v8  ;;  %1839 = vmatpush3.msra.mxu0 %v934_v35  ;;  %v1402_v62 = vld [vmem:[#allocation25 + $0x8] sm:$0xff]  ;;  %s1511_s0 = sshll.u32 %s2759_s28, 4  ;;  %s1512_s0 = int_to_ptr.vmem [resolvable:$true] %s1511_s0 }
 0x1c8   : > { %1924 = vmatprep.subr.bf16.mxu0 %v2750_v5  ;;  %s2604_s5 = scalar_lea.vmem %s1512_s0, 256  ;;  %p2611_p12 = scmp.lt.s32.totalorder %s1512_s0, %s1512_s0 }
 0x1c9   : > { %p2605_p1 = scmp.ne.s32.totalorder %s1512_s0, %s2604_s5  ;;  %p2612_p11 = scmp.lt.s32.totalorder %s2604_s5, %s2604_s5 }
 0x1cb   : > { %p2606_p4 = pnand %p2605_p1, %p2105_p3  ;;  %p2613_p0 = por %p2612_p11, %p2611_p12 }
 0x1cd   : > { %p2607_p10 = pneg %p2606_p4 }
 0x1cf   : > { %p2614_p5 = pnand %p2613_p0, %p2607_p10 }
 0x299   : > { %v806_v19 = vpop.f32.mrb[0].mxu0 }
 0x29a   : > { %v3302_v20 = vadd.f32 %v1750_v17, %v806_v19  ;;  %v1826_v21 = vpop.f32.mrb[1].mxu0 }
 0x29c   : > { %v810_v22 = vadd.f32 %v3302_v20, %v724_v18 }
 0x29e   : > { %2170 = vtanh.f32 %v810_v22 }
 0x2a8   : > { %v2171_v23 = vpop.eup %2170 }
 0x2a9   : > { %1836 = vmatmul.mubr.msk.f32.vlgmr.msra.gmra.mrb[0].mxu1 %vm736_vm3, %v2171_v23 }
 0x2aa   : > { %1845 = vmatprep.mubr.msk.f32.mxu1 %vm2751_vm2, %v2752_v8  ;;  %1844 = vmatpush3.msra.mxu1 %v935_v34 }
 0x2ab   : > { %1939 = vmatprep.subr.bf16.mxu1 %v2750_v5 }
 0x37c   : > { %v892_v25 = vpop.f32.mrb[0].mxu1 }
 0x37d   : > { %v893_v26 = vadd.f32 %v1752_v24, %v892_v25  ;;  %v1837_v27 = vpop.f32.mrb[1].mxu1 }
 0x37e   : > { %v1215_v27 = vld [vmem:[#allocation19 + $0x8] sm:$0xff] }
 0x37f   : > { %v900_v28 = vsel %vm898_vm4, %v893_v26, -inf  ;;  %899 = vst.msk [vmem:[%s897_s27] sm:$0x3] %vm898_vm4, %v893_v26 }
 0x380   : > { %901 = vmax.xlane.f32.xlu0 %v900_v28  ;;  %v1216_v28 = vld [vmem:[#allocation19 + $0x10] sm:$0xff] }
 0x40d   : > { %v902_v29 = vpop.xlane.xlu0 %901 }
 0x40e   : > { %v903_v30 = vsub.f32 %v893_v26, %v902_v29  ;;  %v1214_v26 = vld [vmem:[#allocation19] sm:$0xff] }
 0x40f   : > { %v1940_v29 = vpack.c.bf16 %v1215_v27, %v1214_v26 }
 0x410   : > { %v904_v31 = vmul.f32 1.442695, %v903_v30  ;;  %v1217_v30 = vld [vmem:[#allocation19 + $0x18] sm:$0xff] }
 0x412   : > { %2172 = vpow2.f32 %v904_v31  ;;  %v1943_v31 = vpack.c.bf16 %v1217_v30, %v1216_v28 }
 0x41c   : > { %v2173_v32 = vpop.eup %2172 }
 0x41d   : > { %v906_v33 = vsel %vm898_vm4, %v2173_v32, 0.0 }
 0x41e   : > { %907 = vadd.xlane.f32.xlu0 %v906_v33 }
 0x434   : > { %1193 = vrot.lane.b32.xlu0 %v3302_v20, %s2753_s24 }
 0x4ab   : > { %v908_v36 = vpop.xlane.xlu0 %907 }
 0x4ac   : > { %2174 = vrcp.f32 %v908_v36 }
 0x4af   : > { %v1194_v22 = vpop.permute.xlu0 %1193 }
 0x4b6   : > { %v2175_v43 = vpop.eup %2174 }
 0x4b7   : > { %v910_v44 = vmul.f32 %v2175_v43, %v2173_v32  ;;  %v1304_v43 = vld [vmem:[#allocation22 + $0x18] sm:$0xff] }
 0x4b9   : > { %v918_v45 = vrot.slane %v910_v44, %v917_v42 }
 0x4bb   : > { %v926_v46 = vrot.slane %v918_v45, %v917_v42  ;;  %v919_v47 = vcombine.high %v918_v45, %v918_v45  ;;  %v1305_v45 = vld [vmem:[#allocation22 + $0x20] sm:$0xff] }
 0x4bd   : > { %1841 = vmatmul.mubr.msk.f32.vlgmr.msra.gmra.mrb[2].mxu0 %vm936_vm5, %v926_v46  ;;  %v933_v48 = vrot.slane %v919_v47, %v917_v42  ;;  %v1303_v42 = vld [vmem:[#allocation22 + $0x10] sm:$0xff]  ;;  %v1306_v46 = vld [vmem:[#allocation22 + $0x28] sm:$0xff] }
 0x4be   : > { %1868 = vmatprep.mubr.msk.f32.mxu0 %vm2751_vm2, %v2752_v8  ;;  %1926 = vmatpush3.bf16.msra.mxu0 %v1925_v52  ;;  %v1952_v47 = vpack.c.bf16 %v1306_v46, %v1305_v45  ;;  %v1310_v52 = vld [vmem:[#allocation22 + $0x48] sm:$0xff] }
 0x4bf   : > { %1846 = vmatmul.mubr.msk.f32.vlgmr.msra.gmra.mrb[2].mxu1 %vm936_vm5, %v933_v48  ;;  %1927 = vmatprep.subr.bf16.mxu0 %v2750_v5  ;;  %v1307_v48 = vld [vmem:[#allocation22 + $0x30] sm:$0xff] }
 0x4c0   : > { %1879 = vmatprep.mubr.msk.f32.mxu1 %vm2751_vm2, %v2752_v8  ;;  %1941 = vmatpush3.bf16.msra.mxu1 %v1940_v29  ;;  %v1955_v50 = vpack.c.bf16 %v1308_v49, %v1307_v48 }
 0x4c1   : > { %1942 = vmatprep.subr.bf16.mxu1 %v2750_v5 }
 0x4c2   : > { %1929 = vmatpush3.bf16.msra.mxu0 %v1928_v54 }
 0x4c3   : > { %1930 = vmatprep.subr.bf16.mxu0 %v2750_v5 }
 0x4c4   : > { %1944 = vmatpush3.bf16.msra.mxu1 %v1943_v31 }
 0x4c5   : > { %1945 = vmatprep.subr.bf16.mxu1 %v2750_v5 }
 0x4c6   : > { %1932 = vmatpush3.bf16.msra.mxu0 %v1931_v57 }
 0x4c7   : > { %1933 = vmatprep.subr.bf16.mxu0 %v2750_v5 }
 0x4ca   : > { %1935 = vmatpush3.bf16.msra.mxu0 %v1934_v60 }
 0x4cb   : > { %1936 = vmatprep.subr.bf16.mxu0 %v2750_v5 }
 0x4ce   : > { %1938 = vmatpush3.bf16.msra.mxu0 %v1937_v63  ;;  %v1961_v63 = vpack.c.bf16 %v1402_v62, %v1401_v61 }
 0x4cf   : > { %1960 = vmatprep.subr.bf16.mxu0 %v2750_v5 }
 0x590   : > { %v1005_v0 = vpop.f32.mrb[2].mxu0 }
 0x591   : > { %v1842_v1 = vpop.f32.mrb[3].mxu0 }
 0x592   : > { %v1077_v2 = vpop.f32.mrb[2].mxu1 }
 0x593   : > { %v1083_v3 = vrot.slane %v1077_v2, 7  ;;  %v1847_v4 = vpop.f32.mrb[3].mxu1 }
 0x595   : > { %v1085_v6 = vsel %vm1084_vm6, %v1083_v3, %v1005_v0 }
 0x596   : > { %1086 = vrot.lane.b32.xlu1 %v1085_v6, %s2755_s3 }
 0x59a   : > { %1183 = vrot.lane.b32.xlu1 %v3302_v20, %s2756_s17 }
 0x608   : > { %v3327_v9 = vpop.permute.xlu1 %1086 }
 0x609   : > { %v1090_v11 = vsel %vm1089_vm7, %v723_v7, %v3327_v9 }
 0x60a   : > { %1869 = vmatmul.mubr.msk.f32.vlgmr.msra.gmra.mrb[4].mxu0 %vm1108_vm8, %v1090_v11 }
 0x60b   : > { %1909 = vmatprep.mubr.msk.f32.mxu0 %vm2751_vm2, %v2752_v8  ;;  %1962 = vmatpush3.bf16.msra.mxu0 %v1961_v63 }
 0x60c   : > { %v1184_v16 = vpop.permute.xlu1 %1183 }
 0x6dd   : > { %v1178_v13 = vpop.f32.mrb[4].mxu0 }
 0x6de   : > { %v1179_v14 = vadd.f32 %v1757_v12, %v1178_v13  ;;  %v1870_v15 = vpop.f32.mrb[5].mxu0 }
 0x6e0   : > { %v1186_v17 = vadd.f32 %v1184_v16, %v1179_v14 }
 0x6e2   : > { %v1759_v18 = vmul.f32 -1.442695, %v1186_v17 }
 0x6e4   : > { %2176 = vpow2.f32 %v1759_v18 }
 0x6ee   : > { %v2177_v19 = vpop.eup %2176 }
 0x6ef   : > { %v1190_v20 = vadd.f32 1.0, %v2177_v19 }
 0x6f1   : > { %2178 = vrcp.f32 %v1190_v20 }
 0x6fb   : > { %v2179_v21 = vpop.eup %2178 }
 0x6fc   : > { %v1196_v23 = vmul.f32 %v2179_v21, %v1194_v22  ;;  %v1203_v34 = vsub.f32 1.0, %v2179_v21 }
 0x6fe   : > { %1198 = vrot.lane.b32.xlu1 %v1196_v23, %s2757_s19 }
 0x770   : > { %v1199_v24 = vpop.permute.xlu1 %1198 }
 0x771   : > { %v1201_v25 = vadd.f32 %v1199_v24, %v1179_v14 }
 0x773   : > { %2180 = vtanh.f32 %v1201_v25 }
 0x77d   : > { %v2181_v32 = vpop.eup %2180 }
 0x77e   : > { %1205 = vrot.lane.b32.xlu1 %v2181_v32, %s2756_s17 }
 0x782   : > { %1209 = vrot.lane.b32.xlu1 %v3291_v10, %s2753_s24  ;;  %v1949_v10 = vpack.c.bf16 %v1304_v43, %v1303_v42 }
 0x7f0   : > { %v1206_v33 = vpop.permute.xlu1 %1205 }
 0x7f1   : > { %v1208_v36 = vmul.f32 %v1206_v33, %v1203_v34 }
 0x7f4   : > { %v1210_v35 = vpop.permute.xlu1 %1209 }
 0x7f5   : > { %v1212_v37 = vmul.f32 %v2179_v21, %v1210_v35 }
 0x7f7   : > { %v1213_v38 = vadd.f32 %v1212_v37, %v1208_v36 }
 0x7f9   : > { %1226 = vrot.lane.b32.xlu1 %v1213_v38, %s2756_s17 }
 0x86b   : > { %v1227_v44 = vpop.permute.xlu1 %1226 }
 0x86c   : > { %1489 = vst.msk [vmem:[#allocation2] sm:$0x3] %vm1486_vm9, %v1227_v44  ;;  %1880 = vmatmul.mubr.msk.f32.vlgmr.msra.gmra.mrb[4].mxu1 %vm736_vm3, %v1227_v44 }
 0x86d   : > { %1947 = vmatpush3.bf16.msra.mxu1 %v1946_v41  ;;  %1902 = vmatprep.mubr.msk.f32.mxu1 %vm2751_vm2, %v2752_v8  ;;  %v1958_v8 = vpack.c.bf16 %v1310_v52, %v1309_v51 }
 0x86e   : > { %1948 = vmatprep.subr.bf16.mxu1 %v2750_v5 }
 0x871   : > { %1950 = vmatpush3.bf16.msra.mxu1 %v1949_v10 }
 0x872   : > { %1951 = vmatprep.subr.bf16.mxu1 %v2750_v5 }
 0x875   : > { %1953 = vmatpush3.bf16.msra.mxu1 %v1952_v47 }
 0x876   : > { %1954 = vmatprep.subr.bf16.mxu1 %v2750_v5 }
 0x879   : > { %1956 = vmatpush3.bf16.msra.mxu1 %v1955_v50 }
 0x87a   : > { %1957 = vmatprep.subr.bf16.mxu1 %v2750_v5 }
 0x87d   : > { %1959 = vmatpush3.bf16.msra.mxu1 %v1958_v8 }
 0x93f   : > { %v1296_v54 = vpop.f32.mrb[4].mxu1 }
 0x940   : > { %v1297_v55 = vadd.f32 %v1760_v53, %v1296_v54  ;;  %v1881_v56 = vpop.f32.mrb[5].mxu1 }
 0x942   : > { %v1300_v57 = vsel %vm1089_vm7, %v1297_v55, %v3327_v9  ;;  %1491 = vst.msk [vmem:[#allocation3] sm:$0x3] %vm1490_vm10, %v1297_v55 }
 0x943   : > { %1903 = vmatmul.mubr.msk.f32.vlgmr.msra.gmra.mrb[6].mxu1 %vm1108_vm8, %v1300_v57 }
 0xa16   : > { %v1387_v59 = vpop.f32.mrb[6].mxu1 }
 0xa17   : > { %v1388_v60 = vadd.f32 %v1762_v58, %v1387_v59  ;;  %v1904_v5 = vpop.f32.mrb[7].mxu1 }
 0xa19   : > { %1392 = vrot.lane.b32.xlu1 %v1388_v60, %s2755_s3 }
 0xa8b   : > { %v1393_v0 = vpop.permute.xlu1 %1392 }
 0xa8c   : > { %v1395_v1 = vadd.f32 %v1393_v0, %v1297_v55 }
 0xa8e   : > { %1397 = vrot.lane.b32.xlu1 %v1395_v1, %s2758_s2 }
 0xb00   : > { %v1398_v2 = vpop.permute.xlu1 %1397 }
 0xb01   : > { %v1400_v3 = vmax.f32 %v1395_v1, %v1398_v2 }
 0xb03   : > { %1411 = vrot.lane.b32.xlu0 %v1400_v3, %s2758_s2 }
 0xb75   : > { %v1412_v4 = vpop.permute.xlu0 %1411 }
 0xb76   : > { %1910 = vmatmul.mubr.msk.f32.vlgmr.msra.gmra.mrb[6].mxu0 %vm1089_vm7, %v1412_v4 }
 0xb77   : > { %2617 = shalt.err (!%p2614_p5)
}
 0xb78   : > { %s3491_s29 = sld [smem:[#allocation51_spill]] }
 0xb7e   : > { %s2618_s15 = scalar_lea.hbm %s3491_s29, 256 }
 0xb7f   : > { %p2619_p8 = scmp.ne.s32.totalorder %s3491_s29, %s2618_s15  ;;  %p2624_p13 = scmp.lt.u32.totalorder %s2618_s15, %s3491_s29 }
 0xb81   : > { %p2620_p7 = pnand %p2619_p8, %p2105_p3 }
 0xb83   : > { %p2621_p2 = pneg %p2620_p7 }
 0xb85   : > { %p2626_p9 = pnand %p2624_p13, %p2621_p2 }
 0xb87   : > { %2629 = shalt.err (!%p2626_p9)
}
 0xb88   : > { %s2760_s2 = smov 2   ;;  %v1764_v6 = vld [vmem:[#allocation27] ss:$0 sm:$0xff]  ;;  %s2761_s21 = smov [#allocation28]  }
 0xb89   : > { %2024 = dma.vmem_to_hbm [thread:$0]  (%p2105_p3), %s1512_s0, 256, %s3491_s29, [#allocation30], %s2753_s24, %s2753_s24, %s2760_s2  }
 0xb8a   : > { %s1498_s25 = sshll.u32 %s2761_s21, 4  ;;  %s1485_s15 = scalar_lea.vmem [#allocation28], %s1754_s30  ;;  %s1499_s25 = int_to_ptr.vmem [resolvable:$true] %s1498_s25 }
 0xb8b   : > { %s2630_s27 = scalar_lea.vmem %s1499_s25, 256  ;;  %p2637_p10 = scmp.lt.s32.totalorder %s1499_s25, %s1499_s25 }
 0xb8c   : > { %p2631_p6 = scmp.ne.s32.totalorder %s1499_s25, %s2630_s27  ;;  %p2638_p12 = scmp.lt.s32.totalorder %s2630_s27, %s2630_s27 }
 0xb8e   : > { %p2632_p1 = pnand %p2631_p6, %p2105_p3  ;;  %p2639_p11 = por %p2638_p12, %p2637_p10 }
 0xb90   : > { %p2633_p4 = pneg %p2632_p1 }
 0xb92   : > { %p2640_p0 = pnand %p2639_p11, %p2633_p4 }
 0xc49   : > { %v1481_v7 = vpop.f32.mrb[6].mxu0 }
 0xc4a   : > { %v1482_v9 = vadd.f32 %v1764_v6, %v1481_v7  ;;  %v1911_v11 = vpop.f32.mrb[7].mxu0 }
 0xc4c   : > { %1487 = vst.msk [vmem:[%s1485_s15] sm:$0x3] %vm1486_vm9, %v1482_v9 }
 0xc4d   : > { %2643 = shalt.err (!%p2640_p0)
}
 0xc4e   : > { %s3492_s17 = sld [smem:[#allocation50_spill]] }
 0xc54   : > { %s2644_s19 = scalar_lea.hbm %s3492_s17, 256 }
 0xc55   : > { %p2645_p5 = scmp.ne.s32.totalorder %s3492_s17, %s2644_s19  ;;  %p2650_p2 = scmp.lt.u32.totalorder %s2644_s19, %s3492_s17 }
 0xc57   : > { %p2646_p8 = pnand %p2645_p5, %p2105_p3 }
 0xc59   : > { %p2647_p7 = pneg %p2646_p8 }
 0xc5b   : > { %p2652_p13 = pnand %p2650_p2, %p2647_p7 }
 0xc5d   : > { %2655 = shalt.err (!%p2652_p13)
}
 0xc5e   : > { %2022 = dma.vmem_to_hbm [thread:$0]  (%p2105_p3), %s1499_s25, 256, %s3492_s17, [#allocation6], %s2753_s24, %s2753_s24, %s2760_s2  }
 0xc5f   : > { %2709 = dma.done.wait (%p2105_p3), [#allocation6], 256  }
 0xc60   : > { %2711 = vsyncadd (%p2105_p3), [#allocation6], 4294967040 }
 0xc61   : > { %2713 = dma.done.wait (%p2105_p3), [#allocation30], 256  }
 0xc62   : > { %2715 = vsyncadd (%p2105_p3), [#allocation30], 4294967040 }
 0xc63 PF: > { %p36_p9 = scmp.ge.s32.totalorder %s3180_s18, 10   ;;  %s3493_s21 = smov %s2722_s22 }
 0xc64   : > { %s3494_s22 = smov %s2726_s23  ;;  %s3495_s23 = smov %s3192_s20 }
 0xc65   : > { %s3496_s24 = smov %s3180_s18  ;;  %38 = sbr.rel (!%p36_p9) target bundleno = 20 (0x14), region = 188 }
 0xc6c   :  { %1531 = vsyncpa [#allocation5], 1 }
 0xc6d   :  { %1533 = vsyncpa [#allocation5 + $0x1], 1 }
 0xc6e   :  { %1534 = vsyncpa [#allocation8], 1 }
 0xc6f   :  { %1536 = vsyncpa [#allocation8 + $0x1], 1 }
 0xc70   :  { %1537 = vsyncpa [#allocation11], 1 }
 0xc71   :  { %1538 = vsyncpa [#allocation14], 1 }
 0xc72   :  { %1539 = vsyncpa [#allocation17], 1 }
 0xc73   :  { %1540 = vsyncpa [#allocation20], 1 }
 0xc74   :  { %1541 = vsyncpa [#allocation23], 1 }
 0xc75   :  { %1542 = vsyncpa [#allocation26], 1 }
 0xc76   :  { %1543 = vsyncpa [#allocation6], 1 }
 0xc77   :  { %1545 = vsyncpa [#allocation6 + $0x1], 1 }
 0xc78   :  { %1546 = vsyncpa [#allocation30], 1 }

</bundles_post_ra>
